<compile_context>
chip_gen: v6e
topology: v6e:2x2x1
jax: 0.10.0
libtpu: 0.0.40
codegen_flags: <defaults>
</compile_context>

<pallas_src>
import functools
import math

import jax
import jax.numpy as jnp
from jax.experimental import pallas as pl
from jax.experimental.pallas import tpu as pltpu

LANE = 128


def _round_up(v, m):
    return (v + m - 1) // m * m


# ----------------------------- Pallas kernel -------------------------------


def dagnn_kernel(
    x_ref, a_ref, w1_ref, b1_ref, w2_ref, b2_ref, wp_ref, bp_ref,   # inputs
    o_ref,                                                          # output
    cur_ref, acc_ref, gacc_ref,                                     # scratch
    *, num_classes, n_pad):
    """DAGNN forward. grid = (K hops, row tiles of A, col tiles of A).

    x_ref  : [Np, Fp]   node features (VMEM resident)
    a_ref  : [tm, tn]   streamed tile of the dense gcn-normalized adjacency
    w1_ref : [Fp, Hp]   lin1 weight (input-major), b1_ref [1, Hp]
    w2_ref : [Hp, Cp]   lin2 weight (input-major), b2_ref [1, Cp]
    wp_ref : [1, Cp]    Prop.proj weight as a row vector (zero padded)
    bp_ref : [1, 1]     Prop.proj bias (SMEM scalar)
    o_ref  : [tm, Cp]   log_softmax output tile
    cur_ref : [2*Np, Cp] ping-pong buffer holding A^k z        (VMEM scratch)
    acc_ref : [tm, Cp]   per-row-tile matmul accumulator        (VMEM scratch)
    gacc_ref: [Np, Cp]   running gated sum  sum_k s_k * A^k z   (VMEM scratch)
    """
    k = pl.program_id(0)            # propagation hop, 0..K-1
    i = pl.program_id(1)            # output row tile of A
    j = pl.program_id(2)            # contraction (column) tile of A
    nj = pl.num_programs(2)

    tm, tn = a_ref.shape
    f32 = jnp.float32

    wp_row = wp_ref[...]            # [1, Cp]  (hoisted once per grid step)
    bp = bp_ref[0, 0]               # scalar from SMEM

    # --- one-time init (very first grid step):
    #     z = relu(x W1 + b1) W2 + b2 for ALL rows, seed the gated sum with the
    #     hop-0 term, stash z as the initial propagation state.
    #     (dropout = identity in eval mode; no BatchNorm for generic dataset.)
    @pl.when(jnp.logical_and(k == 0, jnp.logical_and(i == 0, j == 0)))
    def _init():
        h = jnp.dot(x_ref[...], w1_ref[...], preferred_element_type=f32)
        h = jnp.maximum(h + b1_ref[...], 0.0)
        z = jnp.dot(h, w2_ref[...], preferred_element_type=f32) + b2_ref[...]
        # retain score via VPU multiply + XLU lane reduce (no tiny MXU matmul)
        score0 = jax.nn.sigmoid(jnp.sum(z * wp_row, axis=-1, keepdims=True) + bp)
        gacc_ref[...] = score0 * z
        cur_ref[pl.ds(0, n_pad), :] = z

    # ping-pong halves of cur_ref: rows [src*Np, src*Np+Np) hold A^k z.
    src = jax.lax.rem(k, 2)
    dst = 1 - src

    # --- one hop for row tile i:  new_rows = sum_j A[i, j] @ cur[j] ---
    @pl.when(j == 0)
    def _zero_acc():
        acc_ref[...] = jnp.zeros_like(acc_ref)

    col0 = pl.multiple_of(src * n_pad + j * tn, tn)
    rhs = cur_ref[pl.ds(col0, tn), :]
    acc_ref[...] += jnp.dot(a_ref[...], rhs.astype(a_ref.dtype),
                            preferred_element_type=f32)

    # --- row tile finished: gate it, fold into running gated sum, stash as the
    #     next-hop state, and emit the (masked) log_softmax for this tile.
    @pl.when(j == nj - 1)
    def _finish():
        new_rows = acc_ref[...]                                   # [tm, Cp] f32
        score = jax.nn.sigmoid(
            jnp.sum(new_rows * wp_row, axis=-1, keepdims=True) + bp)
        row0 = pl.multiple_of(i * tm, tm)
        gated = gacc_ref[pl.ds(row0, tm), :] + score * new_rows
        gacc_ref[pl.ds(row0, tm), :] = gated
        cur_ref[pl.ds(dst * n_pad + row0, tm), :] = new_rows

        # masked log_softmax over the real classes only (padded lanes -> 0).
        # Written every hop (overwritten until the last) so the output block is
        # always fully defined whenever the pipeline flushes it.
        col = jax.lax.broadcasted_iota(jnp.int32, gated.shape, 1)
        valid = col < num_classes
        logits = jnp.where(valid, gated, -1e30)
        m = jnp.max(logits, axis=-1, keepdims=True)
        e = jnp.exp(logits - m)
        lse = jnp.log(jnp.sum(e, axis=-1, keepdims=True)) + m
        o_ref[...] = jnp.where(valid, logits - lse, 0.0).astype(o_ref.dtype)


# ------------------------------- wrapper ------------------------------------


def dagnn_forward(x, adj, w1, b1, w2, b2, wp, bp, *, K, num_classes,
                  tm=128, tn=128, compute_dtype=jnp.float32):
    """DAGNN forward via one Pallas call.

    x [N,F], adj [N,N] dense gcn-normalized, w1 [F,H], b1 [1,H], w2 [H,C],
    b2 [1,C], wp [C,1], bp [1,1].  compute_dtype controls the dtype of the
    streamed adjacency / propagation matmul inputs (f32 or bf16); gating and
    log_softmax are always f32.
    """
    assert K >= 1
    assert tm % 8 == 0 and tn % LANE == 0
    N, F = x.shape
    H = w1.shape[1]
    C = num_classes
    f32 = jnp.float32
    cdt = jnp.zeros((), compute_dtype).dtype
    itemsize = cdt.itemsize

    n_pad = _round_up(N, math.lcm(tm, tn))
    f_pad = _round_up(F, LANE)
    h_pad = _round_up(H, LANE)
    c_pad = _round_up(C, LANE)
    ni, nj = n_pad // tm, n_pad // tn

    # Zero-padding is mathematically inert: padded feature/class columns stay
    # exactly zero, and padded nodes never reach real rows since their rows and
    # columns of A are zero.  Padded rows/cols are sliced away at the end.
    x_p = jnp.zeros((n_pad, f_pad), f32).at[:N, :F].set(x.astype(f32))
    a_p = jnp.zeros((n_pad, n_pad), cdt).at[:N, :N].set(adj.astype(cdt))
    w1_p = jnp.zeros((f_pad, h_pad), f32).at[:F, :H].set(w1)
    b1_p = jnp.zeros((1, h_pad), f32).at[:, :H].set(b1)
    w2_p = jnp.zeros((h_pad, c_pad), f32).at[:H, :C].set(w2)
    b2_p = jnp.zeros((1, c_pad), f32).at[:, :C].set(b2)
    wp_p = jnp.zeros((1, c_pad), f32).at[0, :C].set(jnp.reshape(wp, (C,)))
    bp_p = jnp.reshape(bp, (1, 1)).astype(f32)

    # Advisory cost for XLA's scheduler around the custom call.
    flops = (2 * n_pad * f_pad * h_pad + 2 * n_pad * h_pad * c_pad
             + 2 * K * n_pad * n_pad * c_pad + 3 * (K + 1) * n_pad * c_pad)
    bytes_accessed = (K * n_pad * n_pad * itemsize              # A streamed once per hop
                      + 4 * (n_pad * f_pad + f_pad * h_pad + h_pad * c_pad)
                      + 4 * n_pad * c_pad)
    transcendentals = (K + 1) * n_pad + n_pad * c_pad
    cost = pl.CostEstimate(flops=int(flops),
                           transcendentals=int(transcendentals),
                           bytes_accessed=int(bytes_accessed))

    # VMEM budget: scratch + residents (x2 buffers) + double-buffered A/out tiles.
    vmem_bytes = (2 * n_pad * c_pad * 4 + tm * c_pad * 4 + n_pad * c_pad * 4
                  + 2 * 4 * (n_pad * f_pad + f_pad * h_pad + h_pad * c_pad
                             + 2 * c_pad + h_pad)
                  + 2 * tm * tn * itemsize + 2 * tm * c_pad * 4)
    vmem_limit = int(min(56 * 2 ** 20, max(32 * 2 ** 20, 2 * vmem_bytes)))

    grid_spec = pltpu.PrefetchScalarGridSpec(
        num_scalar_prefetch=0,
        grid=(K, ni, nj),
        in_specs=[
            pl.BlockSpec((n_pad, f_pad), lambda k, i, j: (0, 0)),   # x (resident)
            pl.BlockSpec((tm, tn), lambda k, i, j: (i, j)),         # A (streamed)
            pl.BlockSpec((f_pad, h_pad), lambda k, i, j: (0, 0)),   # W1 (resident)
            pl.BlockSpec((1, h_pad), lambda k, i, j: (0, 0)),       # b1
            pl.BlockSpec((h_pad, c_pad), lambda k, i, j: (0, 0)),   # W2
            pl.BlockSpec((1, c_pad), lambda k, i, j: (0, 0)),       # b2
            pl.BlockSpec((1, c_pad), lambda k, i, j: (0, 0)),       # proj weight row
            pl.BlockSpec(memory_space=pltpu.MemorySpace.SMEM),      # proj bias scalar
        ],
        out_specs=pl.BlockSpec((tm, c_pad), lambda k, i, j: (i, 0)),
        scratch_shapes=[
            pltpu.VMEM((2 * n_pad, c_pad), jnp.float32),   # ping-pong A^k z state
            pltpu.VMEM((tm, c_pad), jnp.float32),          # per-tile matmul accumulator
            pltpu.VMEM((n_pad, c_pad), jnp.float32),       # gated sum over hops
        ],
    )

    out_padded = pl.pallas_call(
        functools.partial(dagnn_kernel, num_classes=C, n_pad=n_pad),
        out_shape=jax.ShapeDtypeStruct((n_pad, c_pad), jnp.float32),
        grid_spec=grid_spec,
        compiler_params=pltpu.CompilerParams(
            dimension_semantics=("arbitrary", "arbitrary", "arbitrary"),
            vmem_limit_bytes=vmem_limit,
        ),
        cost_estimate=cost,
    )(x_p, a_p, w1_p, b1_p, w2_p, b2_p, wp_p, bp_p)

    return out_padded[:N, :C]


# ------------------------ plain-JAX glue / reference ------------------------


def gcn_norm_dense(edge_index, num_nodes, dtype=jnp.float32):
    """Dense equivalent of gcn_norm (with add_remaining_self_loops) as a
    propagation matrix: A[i, j] = deg^-1/2[j] * w * deg^-1/2[i] for edge j->i."""
    N = num_nodes
    row, col = edge_index[0], edge_index[1]
    ew = jnp.ones((row.shape[0],), dtype=dtype)
    # add_remaining_self_loops: add weight-1 self loops only for nodes without one.
    is_self = (row == col).astype(jnp.int32)
    has_self = jnp.zeros((N,), jnp.int32).at[row].max(is_self) > 0
    loop = jnp.arange(N, dtype=row.dtype)
    loop_w = jnp.where(has_self, 0.0, 1.0).astype(dtype)
    row = jnp.concatenate([row, loop])
    col = jnp.concatenate([col, loop])
    ew = jnp.concatenate([ew, loop_w])
    deg = jnp.zeros((N,), dtype=dtype).at[col].add(ew)
    dinv = jnp.where(deg > 0, deg ** -0.5, 0.0)
    norm = dinv[row] * ew * dinv[col]
    return jnp.zeros((N, N), dtype=dtype).at[col, row].add(norm)


def dagnn_reference(x, adj, w1, b1, w2, b2, wp, bp, K):
    h = jnp.maximum(x @ w1 + b1, 0.0)
    z = h @ w2 + b2
    preds = [z]
    cur = z
    for _ in range(K):
        cur = adj @ cur
        preds.append(cur)
    pps = jnp.stack(preds, axis=1)                       # [N, K+1, C]
    score = jax.nn.sigmoid(pps @ wp + bp)                # [N, K+1, 1]
    out = jnp.sum(score * pps, axis=1)                   # [N, C]
    return jax.nn.log_softmax(out, axis=1)


# ---------------------------------- main ------------------------------------


if __name__ == "__main__":
    # Small, self-consistent shapes implied by the module:
    N = 200           # number of graph nodes
    F_IN = 32         # args.num_feats
    H = 64            # dim_hidden
    C = 8             # args.num_classes
    K = 4             # args.num_layers (propagation hops)
    E = 800           # number of directed edges

    key = jax.random.PRNGKey(0)
    kx, ke, k1, k2, k3, k4, k5, k6 = jax.random.split(key, 8)

    x = jax.random.normal(kx, (N, F_IN), dtype=jnp.float32)
    edge_index = jax.random.randint(ke, (2, E), 0, N, dtype=jnp.int32)

    def lin_init(k, fan_in, shape):
        bound = 1.0 / (fan_in ** 0.5)
        return jax.random.uniform(k, shape, jnp.float32, -bound, bound)

    w1 = lin_init(k1, F_IN, (F_IN, H))    # lin1 weight, [in, out]
    b1 = lin_init(k2, F_IN, (1, H))
    w2 = lin_init(k3, H, (H, C))          # lin2 weight, [in, out]
    b2 = lin_init(k4, H, (1, C))
    wp = lin_init(k5, C, (C, 1))          # Prop.proj weight, [in, out]
    bp = lin_init(k6, C, (1, 1))          # Prop.proj bias

    adj = gcn_norm_dense(edge_index, N, dtype=jnp.float32)
    ref = dagnn_reference(x, adj, w1, b1, w2, b2, wp, bp, K)

    # f32 propagation path (tolerance covers MXU default-precision differences
    # between the in-kernel matmuls and the XLA reference matmuls).
    out = dagnn_forward(x, adj, w1, b1, w2, b2, wp, bp, K=K, num_classes=C)
    out = jax.block_until_ready(out)
    assert out.shape == (N, C)
    assert jnp.allclose(out, ref, atol=2e-2, rtol=2e-2), "f32 kernel mismatch vs reference"

    # bf16 adjacency / propagation inputs (MXU-native on v6e/v7x, halves A HBM
    # traffic); gating, sigmoid and log_softmax stay f32 inside the kernel.
    out_bf16 = dagnn_forward(x, adj, w1, b1, w2, b2, wp, bp, K=K, num_classes=C,
                             compute_dtype=jnp.bfloat16)
    out_bf16 = jax.block_until_ready(out_bf16)
    assert out_bf16.shape == (N, C)
    assert jnp.allclose(out_bf16, ref, atol=0.15, rtol=0.15), "bf16 kernel mismatch vs reference"

    print("KERNEL_OK")
</pallas_src>

<mosaic_0001>
module attributes {stable_mosaic.version = 11 : i64} {
  func.func @dagnn_kernel(%arg0: i32, %arg1: i32, %arg2: i32, %arg3: memref<256x128xf32, #tpu.memory_space<vmem>>, %arg4: memref<128x128xf32, #tpu.memory_space<vmem>>, %arg5: memref<128x128xf32, #tpu.memory_space<vmem>>, %arg6: memref<1x128xf32, #tpu.memory_space<vmem>>, %arg7: memref<128x128xf32, #tpu.memory_space<vmem>>, %arg8: memref<1x128xf32, #tpu.memory_space<vmem>>, %arg9: memref<1x128xf32, #tpu.memory_space<vmem>>, %arg10: memref<1x1xf32, #tpu.memory_space<smem>>, %arg11: memref<128x128xf32, #tpu.memory_space<vmem>>, %arg12: memref<512x128xf32, #tpu.memory_space<vmem>>, %arg13: memref<128x128xf32, #tpu.memory_space<vmem>>, %arg14: memref<256x128xf32, #tpu.memory_space<vmem>>) attributes {dimension_semantics = [#tpu.dimension_semantics<arbitrary>, #tpu.dimension_semantics<arbitrary>, #tpu.dimension_semantics<arbitrary>], iteration_bounds = array<i64: 4, 2, 2>, scalar_prefetch = 0 : i64, scratch_operands = 3 : i64, tpu.core_type = #tpu.core_type<tc>, window_params = [{pipeline_mode = #tpu.pipeline_mode<synchronous>, transform_indices = @transform_0, window_bounds = array<i64: 256, 128>}, {transform_indices = @transform_1, window_bounds = array<i64: 128, 128>}, {pipeline_mode = #tpu.pipeline_mode<synchronous>, transform_indices = @transform_2, window_bounds = array<i64: 128, 128>}, {pipeline_mode = #tpu.pipeline_mode<synchronous>, transform_indices = @transform_3, window_bounds = array<i64: 1, 128>}, {pipeline_mode = #tpu.pipeline_mode<synchronous>, transform_indices = @transform_4, window_bounds = array<i64: 128, 128>}, {pipeline_mode = #tpu.pipeline_mode<synchronous>, transform_indices = @transform_5, window_bounds = array<i64: 1, 128>}, {pipeline_mode = #tpu.pipeline_mode<synchronous>, transform_indices = @transform_6, window_bounds = array<i64: 1, 128>}, {transform_indices = @transform_7, window_bounds = array<i64: 1, 1>}, {transform_indices = @transform_8, window_bounds = array<i64: 128, 128>}]} {
    %c0 = arith.constant 0 : index
    %c0_0 = arith.constant 0 : index
    %0 = vector.load %arg9[%c0, %c0_0] : memref<1x128xf32, #tpu.memory_space<vmem>>, vector<1x128xf32>
    %c0_1 = arith.constant 0 : index
    %c0_2 = arith.constant 0 : index
    %1 = memref.load %arg10[%c0_1, %c0_2] : memref<1x1xf32, #tpu.memory_space<smem>>
    %c0_i32 = arith.constant 0 : i32
    %2 = arith.cmpi eq, %arg0, %c0_i32 : i32
    %c0_i32_3 = arith.constant 0 : i32
    %3 = arith.cmpi eq, %arg1, %c0_i32_3 : i32
    %c0_i32_4 = arith.constant 0 : i32
    %4 = arith.cmpi eq, %arg2, %c0_i32_4 : i32
    %5 = arith.andi %3, %4 : i1
    %6 = arith.andi %2, %5 : i1
    %7 = arith.extui %6 : i1 to i32
    %c0_i32_5 = arith.constant 0 : i32
    %8 = arith.cmpi ne, %7, %c0_i32_5 : i32
    scf.if %8 {
      %c0_17 = arith.constant 0 : index
      %c0_18 = arith.constant 0 : index
      %28 = vector.load %arg3[%c0_17, %c0_18] : memref<256x128xf32, #tpu.memory_space<vmem>>, vector<256x128xf32>
      %c0_19 = arith.constant 0 : index
      %c0_20 = arith.constant 0 : index
      %29 = vector.load %arg5[%c0_19, %c0_20] : memref<128x128xf32, #tpu.memory_space<vmem>>, vector<128x128xf32>
      %cst_21 = arith.constant dense<0.000000e+00> : vector<256x128xf32>
      %30 = tpu.matmul %28, %29, %cst_21 {dimension_numbers = #tpu.dot_dimension_numbers<[1], [0], [0], [1], [0, 0, 1, 1], [], []>} : vector<256x128xf32>, vector<128x128xf32>, vector<256x128xf32> -> vector<256x128xf32>
      %c0_22 = arith.constant 0 : index
      %c0_23 = arith.constant 0 : index
      %31 = vector.load %arg6[%c0_22, %c0_23] : memref<1x128xf32, #tpu.memory_space<vmem>>, vector<1x128xf32>
      %32 = vector.broadcast %31 : vector<1x128xf32> to vector<256x128xf32>
      %33 = arith.addf %30, %32 : vector<256x128xf32>
      %cst_24 = arith.constant 0.000000e+00 : f32
      %34 = vector.broadcast %cst_24 : f32 to vector<256x128xf32>
      %35 = arith.maximumf %33, %34 : vector<256x128xf32>
      %c0_25 = arith.constant 0 : index
      %c0_26 = arith.constant 0 : index
      %36 = vector.load %arg7[%c0_25, %c0_26] : memref<128x128xf32, #tpu.memory_space<vmem>>, vector<128x128xf32>
      %cst_27 = arith.constant dense<0.000000e+00> : vector<256x128xf32>
      %37 = tpu.matmul %35, %36, %cst_27 {dimension_numbers = #tpu.dot_dimension_numbers<[1], [0], [0], [1], [0, 0, 1, 1], [], []>} : vector<256x128xf32>, vector<128x128xf32>, vector<256x128xf32> -> vector<256x128xf32>
      %c0_28 = arith.constant 0 : index
      %c0_29 = arith.constant 0 : index
      %38 = vector.load %arg8[%c0_28, %c0_29] : memref<1x128xf32, #tpu.memory_space<vmem>>, vector<1x128xf32>
      %39 = vector.broadcast %38 : vector<1x128xf32> to vector<256x128xf32>
      %40 = arith.addf %37, %39 : vector<256x128xf32>
      %41 = vector.broadcast %0 : vector<1x128xf32> to vector<256x128xf32>
      %42 = arith.mulf %40, %41 : vector<256x128xf32>
      %cst_30 = arith.constant dense<0.000000e+00> : vector<256xf32>
      %43 = vector.multi_reduction <add>, %42, %cst_30 [1] : vector<256x128xf32> to vector<256xf32>
      %44 = vector.shape_cast %43 : vector<256xf32> to vector<256x1xf32>
      %45 = vector.broadcast %1 : f32 to vector<256x1xf32>
      %46 = arith.addf %44, %45 : vector<256x1xf32>
      %47 = arith.negf %46 : vector<256x1xf32>
      %48 = math.exp %47 : vector<256x1xf32>
      %cst_31 = arith.constant 1.000000e+00 : f32
      %49 = vector.broadcast %cst_31 : f32 to vector<256x1xf32>
      %50 = arith.addf %49, %48 : vector<256x1xf32>
      %51 = arith.divf %49, %50 : vector<256x1xf32>
      %52 = vector.broadcast %51 : vector<256x1xf32> to vector<256x128xf32>
      %53 = arith.mulf %52, %40 : vector<256x128xf32>
      %c0_32 = arith.constant 0 : index
      %c0_33 = arith.constant 0 : index
      %54 = vector.load %arg14[%c0_32, %c0_33] : memref<256x128xf32, #tpu.memory_space<vmem>>, vector<256x128xf32>
      tpu.vector_store %arg14[%c0_32, %c0_33], %53 {strides = array<i32>} : memref<256x128xf32, #tpu.memory_space<vmem>>, vector<256x128xf32>,
      %c0_34 = arith.constant 0 : index
      %c0_35 = arith.constant 0 : index
      %55 = vector.load %arg12[%c0_34, %c0_35] : memref<512x128xf32, #tpu.memory_space<vmem>>, vector<256x128xf32>
      tpu.vector_store %arg12[%c0_34, %c0_35], %40 {strides = array<i32>} : memref<512x128xf32, #tpu.memory_space<vmem>>, vector<256x128xf32>,
    } else {
    }
    %c2_i32 = arith.constant 2 : i32
    %9 = arith.remsi %arg0, %c2_i32 : i32
    %c1_i32 = arith.constant 1 : i32
    %10 = arith.subi %c1_i32, %9 : i32
    %c0_i32_6 = arith.constant 0 : i32
    %11 = arith.cmpi eq, %arg2, %c0_i32_6 : i32
    %12 = arith.extui %11 : i1 to i32
    %c0_i32_7 = arith.constant 0 : i32
    %13 = arith.cmpi ne, %12, %c0_i32_7 : i32
    scf.if %13 {
      %cst_17 = arith.constant 0.000000e+00 : f32
      %28 = vector.broadcast %cst_17 : f32 to vector<128x128xf32>
      %c0_18 = arith.constant 0 : index
      %c0_19 = arith.constant 0 : index
      %29 = vector.load %arg13[%c0_18, %c0_19] : memref<128x128xf32, #tpu.memory_space<vmem>>, vector<128x128xf32>
      tpu.vector_store %arg13[%c0_18, %c0_19], %28 {strides = array<i32>} : memref<128x128xf32, #tpu.memory_space<vmem>>, vector<128x128xf32>,
    } else {
    }
    %c256_i32 = arith.constant 256 : i32
    %14 = arith.muli %9, %c256_i32 : i32
    %c128_i32 = arith.constant 128 : i32
    %15 = arith.muli %arg2, %c128_i32 : i32
    %16 = arith.addi %14, %15 : i32
    %17 = tpu.assume_multiple %16, 128 : i32
    %18 = arith.index_cast %17 : i32 to index
    %c0_8 = arith.constant 0 : index
    %19 = vector.load %arg12[%18, %c0_8] : memref<512x128xf32, #tpu.memory_space<vmem>>, vector<128x128xf32>
    %c0_9 = arith.constant 0 : index
    %c0_10 = arith.constant 0 : index
    %20 = vector.load %arg13[%c0_9, %c0_10] : memref<128x128xf32, #tpu.memory_space<vmem>>, vector<128x128xf32>
    %c0_11 = arith.constant 0 : index
    %c0_12 = arith.constant 0 : index
    %21 = vector.load %arg4[%c0_11, %c0_12] : memref<128x128xf32, #tpu.memory_space<vmem>>, vector<128x128xf32>
    %cst = arith.constant dense<0.000000e+00> : vector<128x128xf32>
    %22 = tpu.matmul %21, %19, %cst {dimension_numbers = #tpu.dot_dimension_numbers<[1], [0], [0], [1], [0, 0, 1, 1], [], []>} : vector<128x128xf32>, vector<128x128xf32>, vector<128x128xf32> -> vector<128x128xf32>
    %23 = arith.addf %20, %22 : vector<128x128xf32>
    %c0_13 = arith.constant 0 : index
    %c0_14 = arith.constant 0 : index
    %24 = vector.load %arg13[%c0_13, %c0_14] : memref<128x128xf32, #tpu.memory_space<vmem>>, vector<128x128xf32>
    tpu.vector_store %arg13[%c0_13, %c0_14], %23 {strides = array<i32>} : memref<128x128xf32, #tpu.memory_space<vmem>>, vector<128x128xf32>,
    %c1_i32_15 = arith.constant 1 : i32
    %25 = arith.cmpi eq, %arg2, %c1_i32_15 : i32
    %26 = arith.extui %25 : i1 to i32
    %c0_i32_16 = arith.constant 0 : i32
    %27 = arith.cmpi ne, %26, %c0_i32_16 : i32
    scf.if %27 {
      %c0_17 = arith.constant 0 : index
      %c0_18 = arith.constant 0 : index
      %28 = vector.load %arg13[%c0_17, %c0_18] : memref<128x128xf32, #tpu.memory_space<vmem>>, vector<128x128xf32>
      %29 = vector.broadcast %0 : vector<1x128xf32> to vector<128x128xf32>
      %30 = arith.mulf %28, %29 : vector<128x128xf32>
      %cst_19 = arith.constant dense<0.000000e+00> : vector<128xf32>
      %31 = vector.multi_reduction <add>, %30, %cst_19 [1] : vector<128x128xf32> to vector<128xf32>
      %32 = vector.shape_cast %31 : vector<128xf32> to vector<128x1xf32>
      %33 = vector.broadcast %1 : f32 to vector<128x1xf32>
      %34 = arith.addf %32, %33 : vector<128x1xf32>
      %35 = arith.negf %34 : vector<128x1xf32>
      %36 = math.exp %35 : vector<128x1xf32>
      %cst_20 = arith.constant 1.000000e+00 : f32
      %37 = vector.broadcast %cst_20 : f32 to vector<128x1xf32>
      %38 = arith.addf %37, %36 : vector<128x1xf32>
      %39 = arith.divf %37, %38 : vector<128x1xf32>
      %c128_i32_21 = arith.constant 128 : i32
      %40 = arith.muli %arg1, %c128_i32_21 : i32
      %41 = tpu.assume_multiple %40, 128 : i32
      %42 = arith.index_cast %41 : i32 to index
      %c0_22 = arith.constant 0 : index
      %43 = vector.load %arg14[%42, %c0_22] : memref<256x128xf32, #tpu.memory_space<vmem>>, vector<128x128xf32>
      %44 = vector.broadcast %39 : vector<128x1xf32> to vector<128x128xf32>
      %45 = arith.mulf %44, %28 : vector<128x128xf32>
      %46 = arith.addf %43, %45 : vector<128x128xf32>
      %47 = arith.index_cast %41 : i32 to index
      %c0_23 = arith.constant 0 : index
      %48 = vector.load %arg14[%47, %c0_23] : memref<256x128xf32, #tpu.memory_space<vmem>>, vector<128x128xf32>
      tpu.vector_store %arg14[%47, %c0_23], %46 {strides = array<i32>} : memref<256x128xf32, #tpu.memory_space<vmem>>, vector<128x128xf32>,
      %c256_i32_24 = arith.constant 256 : i32
      %49 = arith.muli %10, %c256_i32_24 : i32
      %50 = arith.addi %49, %41 : i32
      %51 = arith.index_cast %50 : i32 to index
      %c0_25 = arith.constant 0 : index
      %52 = vector.load %arg12[%51, %c0_25] : memref<512x128xf32, #tpu.memory_space<vmem>>, vector<128x128xf32>
      tpu.vector_store %arg12[%51, %c0_25], %28 {strides = array<i32>} : memref<512x128xf32, #tpu.memory_space<vmem>>, vector<128x128xf32>,
      %53 = tpu.iota {dimensions = array<i32: 1>} : vector<128x128xi32>
      %c8_i32 = arith.constant 8 : i32
      %54 = vector.broadcast %c8_i32 : i32 to vector<128x128xi32>
      %55 = arith.cmpi slt, %53, %54 : vector<128x128xi32>
      %cst_26 = arith.constant -1.000000e+30 : f32
      %56 = vector.broadcast %cst_26 : f32 to vector<128x128xf32>
      %57 = arith.select %55, %46, %56 : vector<128x128xi1>, vector<128x128xf32>
      %cst_27 = arith.constant dense<0xFF800000> : vector<128xf32>
      %58 = vector.multi_reduction <maximumf>, %57, %cst_27 [1] : vector<128x128xf32> to vector<128xf32>
      %59 = vector.shape_cast %58 : vector<128xf32> to vector<128x1xf32>
      %60 = vector.broadcast %59 : vector<128x1xf32> to vector<128x128xf32>
      %61 = arith.subf %57, %60 : vector<128x128xf32>
      %62 = math.exp %61 : vector<128x128xf32>
      %cst_28 = arith.constant dense<0.000000e+00> : vector<128xf32>
      %63 = vector.multi_reduction <add>, %62, %cst_28 [1] : vector<128x128xf32> to vector<128xf32>
      %64 = vector.shape_cast %63 : vector<128xf32> to vector<128x1xf32>
      %65 = math.log %64 : vector<128x1xf32>
      %66 = arith.addf %65, %59 : vector<128x1xf32>
      %67 = vector.broadcast %66 : vector<128x1xf32> to vector<128x128xf32>
      %68 = arith.subf %57, %67 : vector<128x128xf32>
      %cst_29 = arith.constant 0.000000e+00 : f32
      %69 = vector.broadcast %cst_29 : f32 to vector<128x128xf32>
      %70 = arith.select %55, %68, %69 : vector<128x128xi1>, vector<128x128xf32>
      %c0_30 = arith.constant 0 : index
      %c0_31 = arith.constant 0 : index
      %71 = vector.load %arg11[%c0_30, %c0_31] : memref<128x128xf32, #tpu.memory_space<vmem>>, vector<128x128xf32>
      tpu.vector_store %arg11[%c0_30, %c0_31], %70 {strides = array<i32>} : memref<128x128xf32, #tpu.memory_space<vmem>>, vector<128x128xf32>,
    } else {
    }
    return
  }
  func.func @transform_0(%arg0: i32, %arg1: i32, %arg2: i32) -> (i32, i32) {
    %c0_i32 = arith.constant 0 : i32
    %c0_i32_0 = arith.constant 0 : i32
    %c0_i32_1 = arith.constant 0 : i32
    return %c0_i32, %c0_i32_0 : i32, i32
  }
  func.func @transform_1(%arg0: i32, %arg1: i32, %arg2: i32) -> (i32, i32) {
    %c0_i32 = arith.constant 0 : i32
    return %arg1, %arg2 : i32, i32
  }
  func.func @transform_2(%arg0: i32, %arg1: i32, %arg2: i32) -> (i32, i32) {
    %c0_i32 = arith.constant 0 : i32
    %c0_i32_0 = arith.constant 0 : i32
    %c0_i32_1 = arith.constant 0 : i32
    return %c0_i32, %c0_i32_0 : i32, i32
  }
  func.func @transform_3(%arg0: i32, %arg1: i32, %arg2: i32) -> (i32, i32) {
    %c0_i32 = arith.constant 0 : i32
    %c0_i32_0 = arith.constant 0 : i32
    %c0_i32_1 = arith.constant 0 : i32
    return %c0_i32, %c0_i32_0 : i32, i32
  }
  func.func @transform_4(%arg0: i32, %arg1: i32, %arg2: i32) -> (i32, i32) {
    %c0_i32 = arith.constant 0 : i32
    %c0_i32_0 = arith.constant 0 : i32
    %c0_i32_1 = arith.constant 0 : i32
    return %c0_i32, %c0_i32_0 : i32, i32
  }
  func.func @transform_5(%arg0: i32, %arg1: i32, %arg2: i32) -> (i32, i32) {
    %c0_i32 = arith.constant 0 : i32
    %c0_i32_0 = arith.constant 0 : i32
    %c0_i32_1 = arith.constant 0 : i32
    return %c0_i32, %c0_i32_0 : i32, i32
  }
  func.func @transform_6(%arg0: i32, %arg1: i32, %arg2: i32) -> (i32, i32) {
    %c0_i32 = arith.constant 0 : i32
    %c0_i32_0 = arith.constant 0 : i32
    %c0_i32_1 = arith.constant 0 : i32
    return %c0_i32, %c0_i32_0 : i32, i32
  }
  func.func @transform_7(%arg0: i32, %arg1: i32, %arg2: i32) -> (i32, i32) {
    %c0_i32 = arith.constant 0 : i32
    %c0_i32_0 = arith.constant 0 : i32
    %c0_i32_1 = arith.constant 0 : i32
    return %c0_i32, %c0_i32_0 : i32, i32
  }
  func.func @transform_8(%arg0: i32, %arg1: i32, %arg2: i32) -> (i32, i32) {
    %c0_i32 = arith.constant 0 : i32
    %c0_i32_0 = arith.constant 0 : i32
    return %arg1, %c0_i32 : i32, i32
  }
}

</mosaic_0001>

<bundles_post_ra>
// kernel: tpu_custom_call.1
= control target key start
LH: loop header
LB: loop body
LE: loop exit
PB: predicated region body
PF: predicated region fallthrough
CT: control target
= control target key end

     0   :  { %s4501_s0 = inlined_call_operand.hbm [shape: f32[256,128], index: 0, kind: input, shape index: {}]   ;;  %s4502_s1 = inlined_call_operand.hbm [shape: f32[256,256], index: 1, kind: input, shape index: {}]   ;;  %s4503_s2 = inlined_call_operand.hbm [shape: f32[128,128], index: 2, kind: input, shape index: {}]   ;;  %s4504_s3 = inlined_call_operand.vmem [shape: f32[1,128], index: 3, kind: input, shape index: {}]   ;;  %s4505_s4 = inlined_call_operand.hbm [shape: f32[128,128], index: 4, kind: input, shape index: {}]   ;;  %s4506_s5 = inlined_call_operand.vmem [shape: f32[1,128], index: 5, kind: input, shape index: {}]   ;;  %s4507_s6 = inlined_call_operand.vmem [shape: f32[1,128], index: 6, kind: input, shape index: {}]   ;;  %s4508_s7 = inlined_call_operand.<no memory space> [shape: f32[1,1], index: 7, kind: input, shape index: {}]   ;;  %s4509_s8 = inlined_call_operand.hbm [shape: f32[256,128], index: 8, kind: output, shape index: {}]  }
   0x1   :  { %4525 = sst [smem:[#allocation28_spill]] %s4501_s0 }
   0x2   :  { %4526 = sst [smem:[#allocation29_spill]] %s4503_s2 }
   0x3   :  { %4527 = sst [smem:[#allocation30_spill]] %s4504_s3 }
   0x4   :  { %4528 = sst [smem:[#allocation31_spill]] %s4505_s4 }
   0x5   :  { %4529 = sst [smem:[#allocation32_spill]] %s4506_s5 }
   0x6   :  { %4530 = sst [smem:[#allocation33_spill]] %s4507_s6 }
   0x7   :  { %4531 = sst [smem:[#allocation34_spill]] %s4509_s8 }
   0x8   :  { %13 = sst [smem:[#allocation5]] %s4508_s7 }
   0x9   :  { %14 = vsyncpa [#allocation7], 0 }
   0xa   :  { %15 = vsyncpa [#allocation10], 0 }
   0xb   :  { %17 = vsyncpa [#allocation10 + $0x1], 0 }
   0xc   :  { %18 = vsyncpa [#allocation13], 0 }
   0xd   :  { %19 = vsyncpa [#allocation8], 0 }
   0xe   :  { %21 = vsyncpa [#allocation8 + $0x1], 0  ;;  %s3472_s29 = smov 0   ;;  %s3474_s30 = smov 0  }
   0xf   :  { %s3476_s9 = smov 0   ;;  %s3478_s10 = smov 0  }
  0x10   :  { %s3480_s11 = smov 0   ;;  %s3482_s12 = smov 0  }
  0x11   :  { %s3484_s13 = smov 0   ;;  %s3486_s7 = smov 0  }
  0x12   :  { %s3488_s14 = smov 0   ;;  %s3490_s15 = smov 0  }
  0x13   :  { %s3492_s16 = smov 0   ;;  %s3494_s17 = smov 0  }
  0x14   :  { %s3496_s18 = smov 0  }
  0x15 LB: > { %4532 = sst [smem:[#allocation20_spill]] %s3363_s29  ;;  %s3536_s19 = sadd.s32 4294967295, %s3411_s18   ;;  %s3411_s18 = sphi %s3496_s18, %s27_s18   ;;  %s3407_s17 = sphi %s3494_s17, %s4587_s17   ;;  %s3403_s16 = sphi %s3492_s16, %s4586_s16   ;;  %s3399_s15 = sphi %s3490_s15, %s4585_s15   ;;  %s3395_s14 = sphi %s3488_s14, %s4573_s14   ;;  %s3391_s7 = sphi %s3486_s7, %s4584_s7   ;;  %s3387_s13 = sphi %s3484_s13, %s4583_s13   ;;  %s3383_s12 = sphi %s3482_s12, %s4582_s12   ;;  %s3379_s11 = sphi %s3480_s11, %s4581_s11   ;;  %s3375_s10 = sphi %s3478_s10, %s4580_s10   ;;  %s3371_s9 = sphi %s3476_s9, %s4579_s9   ;;  %s3367_s30 = sphi %s3474_s30, %s4578_s30   ;;  %s3363_s29 = sphi %s3472_s29, %s4577_s29  }
  0x16   : > { %4533 = sst [smem:[#allocation21_spill]] %s3395_s14  ;;  %s2290_s20 = sadd.s32 4294967294, %s3411_s18  }
  0x17   : > { %4534 = sst [smem:[#allocation22_spill]] %s3407_s17  ;;  %p83_p0 = scmp.ne.s32.totalorder %s3383_s12, %s3379_s11 }
  0x18   : > { %4535 = sst [smem:[#allocation23_spill]] %s3411_s18  ;;  %p84_p1 = scmp.eq.s32.totalorder %s3411_s18, 0 }
  0x19   : > { %p89_p2 = scmp.ne.s32.totalorder %s3379_s11, %s3375_s10  ;;  %p4510_p3 = scmp.eq.s32.totalorder %s3536_s19, 0 }
  0x1a   : > { %p3546_p4 = por %p84_p1, %p83_p0  ;;  %p238_p5 = scmp.ne.s32.totalorder %s3371_s9, %s3367_s30 }
  0x1b   : > { %p3554_p6 = por %p4510_p3, %p89_p2  ;;  %p239_p7 = scmp.eq.s32.totalorder %s3536_s19, 15 }
  0x1c   : > { %p244_p8 = scmp.ne.s32.totalorder %s3367_s30, %s3363_s29  ;;  %p245_p9 = scmp.eq.s32.totalorder %s2290_s20, 15 }
  0x1d   : > { %p3561_p10 = por %p239_p7, %p238_p5  ;;  %p2291_p11 = scmp.ge.s32.totalorder %s3411_s18, 1 }
  0x1e   : > { %p3566_p12 = por %p245_p9, %p244_p8  ;;  %p252_p13 = scmp.lt.s32.totalorder %s3411_s18, 17 }
  0x1f   : > { %s4538_s25 = scalar_select %p3561_p10, 1, 0 }
  0x20   : > { %s4540_s26 = scalar_select %p3566_p12, 1, 0 }
  0x21   : > { %4539 = sst [smem:[#allocation24_spill]] %s4538_s25  ;;  %p3571_p0 = pnand %p2291_p11, %p252_p13 }
  0x22   : > { %4541 = sst [smem:[#allocation25_spill]] %s4540_s26  ;;  %s3413_s28 = smov [#allocation11]  }
  0x23   : > { %p2762_p1 = pneg %p3571_p0  ;;  %s277_s10 = sshll.u32 %s3413_s28, 4  ;;  %s278_s10 = int_to_ptr.vmem [resolvable:$true] %s277_s10 }
  0x24   : > { %p2783_p2 = scmp.lt.s32.totalorder %s3411_s18, 16  ;;  %s3168_s21 = scalar_lea.vmem %s278_s10, 2048 }
  0x25   : > { %p3580_p5 = pnand %p2762_p1, %p4510_p3  ;;  %p3169_p9 = scmp.ne.s32.totalorder %s278_s10, %s3168_s21 }
  0x26   : > { %p3586_p7 = pnand %p2783_p2, %p3546_p4  ;;  %p3176_p12 = scmp.lt.s32.totalorder %s278_s10, %s278_s10 }
  0x27   : > { %p3159_p8 = pneg %p3580_p5  ;;  %p3177_p1 = scmp.lt.s32.totalorder %s3168_s21, %s3168_s21 }
  0x29   : > { %p3171_p11 = pnand %p3169_p9, %p3159_p8  ;;  %p3178_p3 = por %p3177_p1, %p3176_p12 }
  0x2b   : > { %p3172_p13 = pneg %p3171_p11 }
  0x2d   : > { %p3179_p10 = pnand %p3178_p3, %p3172_p13 }
  0x2f   : > { %3182 = shalt.err (!%p3179_p10)
}
  0x30   : > { %s4517_s23 = smov 128   ;;  %s4518_s28 = smov 8  }
  0x31   : > { %s4545_s2 = sld [smem:[#allocation29_spill]]  ;;  %s3416_s8 = smov [#allocation6]  }
  0x32   : > { %s264_s25 = sshll.u32 %s3416_s8, 4  ;;  %s3417_s5 = smov [#allocation12]   ;;  %s265_s25 = int_to_ptr.vmem [resolvable:$true] %s264_s25 }
  0x33   : > { %s293_s3 = sshll.u32 %s3417_s5, 4  ;;  %s3194_s21 = scalar_lea.vmem %s265_s25, 4096  ;;  %s294_s3 = int_to_ptr.vmem [resolvable:$true] %s293_s3 }
  0x34   : > { %p3195_p3 = scmp.ne.s32.totalorder %s265_s25, %s3194_s21  ;;  %p3202_p12 = scmp.lt.s32.totalorder %s265_s25, %s265_s25 }
  0x35   : > { %p3203_p2 = scmp.lt.s32.totalorder %s3194_s21, %s3194_s21 }
  0x36   : > { %p3197_p4 = pnand %p3195_p3, %p3159_p8 }
  0x37   : > { %2768 = dma.hbm_to_vmem [thread:$0]  (!%p3580_p5), %s4545_s2, 2048, %s278_s10, [#allocation10], %s4517_s23, %s4517_s23, %s4518_s28  }
  0x38   : > { %p3198_p10 = pneg %p3197_p4  ;;  %p3204_p9 = por %p3203_p2, %p3202_p12 }
  0x3a   : > { %p3205_p11 = pnand %p3204_p9, %p3198_p10 }
  0x3c   : > { %3208 = shalt.err (!%p3205_p11)
}
  0x3d   : > { %s4546_s0 = sld [smem:[#allocation28_spill]]  ;;  %s3220_s29 = scalar_lea.vmem %s294_s3, 2048 }
  0x3e   : > { %p3221_p13 = scmp.ne.s32.totalorder %s294_s3, %s3220_s29  ;;  %p3228_p4 = scmp.lt.s32.totalorder %s294_s3, %s294_s3 }
  0x3f   : > { %p3229_p12 = scmp.lt.s32.totalorder %s3220_s29, %s3220_s29 }
  0x40   : > { %p3223_p1 = pnand %p3221_p13, %p3159_p8 }
  0x41   : > { %p3230_p10 = por %p3229_p12, %p3228_p4 }
  0x42   : > { %p3224_p3 = pneg %p3223_p1 }
  0x43   : > { %2765 = dma.hbm_to_vmem [thread:$0]  (!%p3580_p5), %s4546_s0, 4096, %s265_s25, [#allocation7], %s4517_s23, %s4517_s23, %s4518_s28  }
  0x44   : > { %p3231_p2 = pnand %p3230_p10, %p3224_p3 }
  0x46   : > { %3234 = shalt.err (!%p3231_p2)
}
  0x47   : > { %s4547_s4 = sld [smem:[#allocation31_spill]]  ;;  %s39_s25 = sadd.s32 1, %s3399_s15 }
  0x48   : > { %s42_s20 = sadd.s32 1, %s3403_s16  ;;  %p40_p8 = scmp.ge.s32.totalorder %s39_s25, 2 }
  0x49   : > { %s46_s21 = sadd.s32 1, %s3407_s17  ;;  %s316_s8 = sand.u32 1, %s3411_s18  }
  0x4a   : > { %s318_s5 = sand.u32 1, %s3383_s12   ;;  %s4589_s25 = smov (%p40_p8, %s39_s25), 0 }
  0x4b   : > { %4548 = sst [smem:[#allocation26_spill]] %s4589_s25  ;;  %s4591_s20 = smov (!%p40_p8, %s42_s20), %s3403_s16 }
  0x4c   : > { %s72_s29 = ssub.s32 %s3399_s15, %s4589_s25  ;;  %p44_p9 = scmp.ge.s32.totalorder %s4591_s20, 2 }
  0x4d   : > { %2771 = dma.hbm_to_vmem [thread:$0]  (!%p3580_p5), %s4547_s4, 2048, %s294_s3, [#allocation13], %s4517_s23, %s4517_s23, %s4518_s28  }
  0x4e   : > { %s2296_s26 = sshll.u32 %s318_s5, 7  ;;  %s2368_s10 = sshll.u32 %s3403_s16, 5 }
  0x4f   : > { %s4593_s20 = smov (%p44_p9, %s4591_s20), 0  ;;  %s4595_s21 = smov (!%p44_p9, %s46_s21), %s3407_s17 }
  0x50   : > { %4549 = sst [smem:[#allocation27_spill]] %s4593_s20  ;;  %s71_s3 = ssub.s32 %s3403_s16, %s4593_s20 }
  0x51   : > { %s326_s23 = sadd.s32 %s3399_s15, %s2368_s10  ;;  %p48_p5 = scmp.ge.s32.totalorder %s4595_s21, 4 }
  0x52   : > { %s73_s28 = sor.u32 %s72_s29, %s71_s3  ;;  %p226_p13 = scmp.eq.s32.totalorder %s71_s3, 0 }
  0x53   : > { %p74_p11 = scmp.eq.s32.totalorder %s73_s28, 0  ;;  %s4597_s21 = smov (%p48_p5, %s4595_s21), 0 }
  0x54   : > { %s4550_s0 = sadd.s32 1, %s3383_s12  ;;  %s4551_s4 = sadd.s32 1, %s3371_s9 }
  0x55   : > { %s3647_s2 = scalar_select %p74_p11, %s3383_s12, %s4550_s0  }
  0x56   : > { %s3652_s25 = scalar_select %p226_p13, %s3371_s9, %s4551_s4  }
  0x57   : > { %s2299_s5 = sshll.u32 %s326_s23, 7  ;;  %s320_s18 = scalar_lea.vmem [#allocation9], %s2296_s26 }
  0x58   : > { %s329_s6 = sshll.u32 %s320_s18, 4  ;;  %s328_s20 = scalar_lea.hbm %s4502_s1, %s2299_s5  ;;  %s330_s6 = int_to_ptr.vmem [resolvable:$true] %s329_s6 }
  0x59   : > { %s317_s10 = scalar_lea.sflag [#allocation10], %s316_s8  ;;  %p3237_p1 = pneg %p3586_p7 }
  0x5a   : > { %s3248_s28 = scalar_lea.vmem %s330_s6, 2048  ;;  %s3418_s0 = smov [#allocation9]  }
  0x5b   : > { %p3249_p3 = scmp.ne.s32.totalorder %s330_s6, %s3248_s28  ;;  %s3253_s29 = sshll.u32 %s3418_s0, 4  ;;  %s3254_s29 = int_to_ptr.vmem [resolvable:$false] %s3253_s29 }
  0x5c   : > { %s3255_s4 = scalar_lea.vmem %s3254_s29, 4096  ;;  %p3256_p10 = scmp.lt.s32.totalorder %s330_s6, %s3254_s29 }
  0x5d   : > { %p3251_p4 = pnand %p3249_p3, %p3237_p1  ;;  %p3257_p2 = scmp.lt.s32.totalorder %s3255_s4, %s3248_s28 }
  0x5f   : > { %p3252_p12 = pneg %p3251_p4  ;;  %p3258_p8 = por %p3257_p2, %p3256_p10 }
  0x61   : > { %p3259_p9 = pnand %p3258_p8, %p3252_p12 }
  0x63   : > { %3262 = shalt.err (!%p3259_p9)
}
  0x64   : > { %s3419_s18 = smov 256   ;;  %s4552_s14 = smov 8  }
  0x65   : > { %s4553_s17 = smov 128   ;;  %341 = sbr.rel (%p3571_p0) target bundleno = 1630 (0x65e), region = 52 }
  0x66   : > { %2775 = dma.hbm_to_vmem [thread:$0]  (!%p3586_p7), %s328_s20, 2048, %s330_s6, %s317_s10, %s3419_s18, %s4553_s17, %s4552_s14  }
  0x67   : > { %p4554_p5 = scmp.eq.s32.totalorder (!%p3571_p0), %s3536_s19, 0 }
  0x6a   : > { %3342 = dma.done.wait (%p4554_p5), [#allocation7], 4096   ;;  %p4555_p11 = pmov %p4554_p5 }
  0x6b   : > { %s347_s23 = sand.u32 1, %s3536_s19   ;;  %s349_s8 = sand.u32 1, %s3379_s11  }
  0x6c   : > { %3344 = vsyncadd (%p4555_p11), [#allocation7], 4294963200  ;;  %s2302_s26 = sshll.u32 %s349_s8, 7  ;;  %s348_s3 = scalar_lea.sflag [#allocation10], %s347_s23 }
  0x6d   : > { %s3671_s22 = scalar_lea.vmem [#allocation9], %s2302_s26 }
  0x6e   : > { %3346 = dma.done.wait (%p3554_p6), %s348_s3, 2048  }
  0x6f   : > { %3348 = vsyncadd (%p3554_p6), %s348_s3, 4294965248  ;;  %p4556_p0 = pmov %p4554_p5 }
  0x71   : > { %3350 = dma.done.wait (%p4556_p0), [#allocation10], 2048   ;;  %p4557_p7 = pmov %p4556_p0 }
  0x72   : > { %p4558_p13 = pmov %p4556_p0 }
  0x73   : > { %3352 = vsyncadd (%p4557_p7), [#allocation10], 4294965248 }
  0x74   : > { %3354 = dma.done.wait (%p4558_p13), [#allocation13], 2048   ;;  %p4559_p1 = pmov %p4556_p0 }
  0x75   : > { %s4560_s6 = sld [smem:[#allocation21_spill]]  ;;  %s389_s27 = sand.u32 1, %s3367_s30  }
  0x76   : > { %3356 = vsyncadd (%p4559_p1), [#allocation13], 4294965248  ;;  %s3686_s24 = sld [smem:[#allocation5]]  ;;  %s2305_s20 = sshll.u32 %s389_s27, 7 }
  0x77   : > { %p397_p6 = scmp.eq.s32.totalorder %s3391_s7, 0  ;;  %p398_p3 = scmp.eq.s32.totalorder %s3387_s13, 0 }
  0x78   : > { %s4561_s28 = sld [smem:[#allocation33_spill]]  ;;  %s3698_s19 = scalar_lea.vmem [#allocation14], %s2305_s20 }
  0x79   : > { %p399_p12 = pnand %p398_p3, %p397_p6 }
  0x7b   : > { %p396_p4 = scmp.eq.s32.totalorder %s4560_s6, 0  ;;  %p400_p10 = pneg %p399_p12 }
  0x7d   : > { %p401_p2 = pnand %p400_p10, %p396_p4 }
  0x7e   : > { %v3696_v0 = vld [vmem:[%s4561_s28] sm:$0x1]  ;;  %s4562_s4 = sld [smem:[#allocation30_spill]] (!%p401_p2) }
  0x7f   : > { %404 = sbr.rel (%p401_p2) target bundleno = 801 (0x321), region = 72  ;;  %s4563_s17 = sld [smem:[#allocation32_spill]] (!%p401_p2) }
  0x84   : > { %v452_v1 = vld [vmem:[#allocation11 + $0x78] sm:$0xff]  ;;  %v451_v2 = vld [vmem:[#allocation11 + $0x70] sm:$0xff]  ;;  %v450_v3 = vld [vmem:[#allocation11 + $0x68] sm:$0xff] }
  0x85   : > { %2498 = vmatprep.subr.mxu0 %v452_v1  ;;  %v449_v4 = vld [vmem:[#allocation11 + $0x60] sm:$0xff]  ;;  %v448_v6 = vld [vmem:[#allocation11 + $0x58] sm:$0xff]  ;;  %v447_v7 = vld [vmem:[#allocation11 + $0x50] sm:$0xff] }
  0x86   : > { %2499 = vmatpush3.msra.mxu0 %v452_v1  ;;  %v405_v5 = vld [vmem:[#allocation6] sm:$0xff]  ;;  %v446_v8 = vld [vmem:[#allocation11 + $0x48] sm:$0xff]  ;;  %v444_v10 = vld [vmem:[#allocation11 + $0x38] sm:$0xff] }
  0x87   : > { %2500 = vmatprep.subr.mxu0 %v451_v2  ;;  %2530 = vmatprep.mubr.f32.mxu0 %v405_v5  ;;  %v445_v9 = vld [vmem:[#allocation11 + $0x40] sm:$0xff]  ;;  %v443_v11 = vld [vmem:[#allocation11 + $0x30] sm:$0xff]  ;;  %v732_v12 = vld [vmem:[#allocation12 + $0x78] sm:$0xff] }
  0x88   : > { %2501 = vmatpush3.msra.mxu0 %v451_v2  ;;  %v731_v13 = vld [vmem:[#allocation12 + $0x70] sm:$0xff]  ;;  %2578 = vmatprep.subr.mxu1 %v732_v12  ;;  %v442_v14 = vld [vmem:[#allocation11 + $0x28] sm:$0xff]  ;;  %v441_v16 = vld [vmem:[#allocation11 + $0x20] sm:$0xff] }
  0x89   : > { %2502 = vmatprep.subr.mxu0 %v450_v3  ;;  %2579 = vmatpush3.msra.mxu1 %v732_v12  ;;  %v730_v15 = vld [vmem:[#allocation12 + $0x68] sm:$0xff]  ;;  %v729_v17 = vld [vmem:[#allocation12 + $0x60] sm:$0xff]  ;;  %v440_v18 = vld [vmem:[#allocation11 + $0x18] sm:$0xff] }
  0x8a   : > { %2503 = vmatpush3.msra.mxu0 %v450_v3  ;;  %2580 = vmatprep.subr.mxu1 %v731_v13  ;;  %v728_v19 = vld [vmem:[#allocation12 + $0x58] sm:$0xff]  ;;  %v439_v20 = vld [vmem:[#allocation11 + $0x10] sm:$0xff]  ;;  %v438_v22 = vld [vmem:[#allocation11 + $0x8] sm:$0xff] }
  0x8b   : > { %2504 = vmatprep.subr.mxu0 %v449_v4  ;;  %2581 = vmatpush3.msra.mxu1 %v731_v13  ;;  %v727_v21 = vld [vmem:[#allocation12 + $0x50] sm:$0xff]  ;;  %v726_v23 = vld [vmem:[#allocation12 + $0x48] sm:$0xff]  ;;  %v437_v24 = vld [vmem:[#allocation11] sm:$0xff] }
  0x8c   : > { %2505 = vmatpush3.msra.mxu0 %v449_v4  ;;  %2582 = vmatprep.subr.mxu1 %v730_v15  ;;  %v725_v25 = vld [vmem:[#allocation12 + $0x40] sm:$0xff]  ;;  %v406_v26 = vld [vmem:[#allocation6 + $0x8] sm:$0xff]  ;;  %v724_v27 = vld [vmem:[#allocation12 + $0x38] sm:$0xff] }
  0x8d   : > { %2506 = vmatprep.subr.mxu0 %v448_v6  ;;  %2583 = vmatpush3.msra.mxu1 %v730_v15  ;;  %v407_v28 = vld [vmem:[#allocation6 + $0x10] sm:$0xff]  ;;  %v408_v30 = vld [vmem:[#allocation6 + $0x18] sm:$0xff]  ;;  %v722_v31 = vld [vmem:[#allocation12 + $0x28] sm:$0xff] }
  0x8e   : > { %2507 = vmatpush3.msra.mxu0 %v448_v6  ;;  %2584 = vmatprep.subr.mxu1 %v729_v17  ;;  %v723_v29 = vld [vmem:[#allocation12 + $0x30] sm:$0xff]  ;;  %v409_v32 = vld [vmem:[#allocation6 + $0x20] sm:$0xff]  ;;  %v410_v34 = vld [vmem:[#allocation6 + $0x28] sm:$0xff] }
  0x8f   : > { %2508 = vmatprep.subr.mxu0 %v447_v7  ;;  %2585 = vmatpush3.msra.mxu1 %v729_v17  ;;  %v721_v33 = vld [vmem:[#allocation12 + $0x20] sm:$0xff]  ;;  %v411_v35 = vld [vmem:[#allocation6 + $0x30] sm:$0xff]  ;;  %v412_v36 = vld [vmem:[#allocation6 + $0x38] sm:$0xff] }
  0x90   : > { %2509 = vmatpush3.msra.mxu0 %v447_v7  ;;  %2586 = vmatprep.subr.mxu1 %v728_v19  ;;  %v413_v37 = vld [vmem:[#allocation6 + $0x40] sm:$0xff]  ;;  %v414_v38 = vld [vmem:[#allocation6 + $0x48] sm:$0xff]  ;;  %v415_v39 = vld [vmem:[#allocation6 + $0x50] sm:$0xff] }
  0x91   : > { %2510 = vmatprep.subr.mxu0 %v446_v8  ;;  %2587 = vmatpush3.msra.mxu1 %v728_v19  ;;  %v416_v40 = vld [vmem:[#allocation6 + $0x58] sm:$0xff]  ;;  %v417_v41 = vld [vmem:[#allocation6 + $0x60] sm:$0xff]  ;;  %v418_v42 = vld [vmem:[#allocation6 + $0x68] sm:$0xff] }
  0x92   : > { %2511 = vmatpush3.msra.mxu0 %v446_v8  ;;  %2588 = vmatprep.subr.mxu1 %v727_v21  ;;  %v419_v43 = vld [vmem:[#allocation6 + $0x70] sm:$0xff]  ;;  %v420_v44 = vld [vmem:[#allocation6 + $0x78] sm:$0xff]  ;;  %v421_v45 = vld [vmem:[#allocation6 + $0x80] sm:$0xff] }
  0x93   : > { %2512 = vmatprep.subr.mxu0 %v445_v9  ;;  %2589 = vmatpush3.msra.mxu1 %v727_v21  ;;  %v422_v46 = vld [vmem:[#allocation6 + $0x88] sm:$0xff]  ;;  %v423_v47 = vld [vmem:[#allocation6 + $0x90] sm:$0xff]  ;;  %v424_v48 = vld [vmem:[#allocation6 + $0x98] sm:$0xff] }
  0x94   : > { %2513 = vmatpush3.msra.mxu0 %v445_v9  ;;  %2590 = vmatprep.subr.mxu1 %v726_v23  ;;  %v425_v49 = vld [vmem:[#allocation6 + $0xa0] sm:$0xff]  ;;  %v426_v50 = vld [vmem:[#allocation6 + $0xa8] sm:$0xff]  ;;  %v427_v51 = vld [vmem:[#allocation6 + $0xb0] sm:$0xff] }
  0x95   : > { %2514 = vmatprep.subr.mxu0 %v444_v10  ;;  %2591 = vmatpush3.msra.mxu1 %v726_v23  ;;  %v428_v52 = vld [vmem:[#allocation6 + $0xb8] sm:$0xff]  ;;  %v429_v53 = vld [vmem:[#allocation6 + $0xc0] sm:$0xff]  ;;  %v430_v54 = vld [vmem:[#allocation6 + $0xc8] sm:$0xff] }
  0x96   : > { %2515 = vmatpush3.msra.mxu0 %v444_v10  ;;  %2592 = vmatprep.subr.mxu1 %v725_v25  ;;  %v431_v55 = vld [vmem:[#allocation6 + $0xd0] sm:$0xff]  ;;  %v432_v56 = vld [vmem:[#allocation6 + $0xd8] sm:$0xff]  ;;  %v433_v57 = vld [vmem:[#allocation6 + $0xe0] sm:$0xff] }
  0x97   : > { %2516 = vmatprep.subr.mxu0 %v443_v11  ;;  %2593 = vmatpush3.msra.mxu1 %v725_v25  ;;  %v434_v58 = vld [vmem:[#allocation6 + $0xe8] sm:$0xff]  ;;  %v435_v59 = vld [vmem:[#allocation6 + $0xf0] sm:$0xff]  ;;  %v436_v60 = vld [vmem:[#allocation6 + $0xf8] sm:$0xff] }
  0x98   : > { %2517 = vmatpush3.msra.mxu0 %v443_v11  ;;  %2594 = vmatprep.subr.mxu1 %v724_v27  ;;  %v720_v61 = vld [vmem:[#allocation12 + $0x18] sm:$0xff]  ;;  %v719_v62 = vld [vmem:[#allocation12 + $0x10] sm:$0xff]  ;;  %v718_v63 = vld [vmem:[#allocation12 + $0x8] sm:$0xff] }
  0x99   : > { %2518 = vmatprep.subr.mxu0 %v442_v14  ;;  %2595 = vmatpush3.msra.mxu1 %v724_v27  ;;  %v717_v1 = vld [vmem:[#allocation12] sm:$0xff] }
  0x9a   : > { %2519 = vmatpush3.msra.mxu0 %v442_v14  ;;  %2596 = vmatprep.subr.mxu1 %v723_v29  ;;  %v3703_v2 = vld [vmem:[%s4562_s4] ss:$0 sm:$0xff] }
  0x9b   : > { %2520 = vmatprep.subr.mxu0 %v441_v16  ;;  %2597 = vmatpush3.msra.mxu1 %v723_v29 }
  0x9c   : > { %2521 = vmatpush3.msra.mxu0 %v441_v16  ;;  %2598 = vmatprep.subr.mxu1 %v722_v31 }
  0x9d   : > { %2522 = vmatprep.subr.mxu0 %v440_v18  ;;  %2599 = vmatpush3.msra.mxu1 %v722_v31 }
  0x9e   : > { %2523 = vmatpush3.msra.mxu0 %v440_v18  ;;  %2600 = vmatprep.subr.mxu1 %v721_v33 }
  0x9f   : > { %2524 = vmatprep.subr.mxu0 %v439_v20  ;;  %2601 = vmatpush3.msra.mxu1 %v721_v33 }
  0xa0   : > { %2525 = vmatpush3.msra.mxu0 %v439_v20  ;;  %2602 = vmatprep.subr.mxu1 %v720_v61 }
  0xa1   : > { %2526 = vmatprep.subr.mxu0 %v438_v22  ;;  %2603 = vmatpush3.msra.mxu1 %v720_v61 }
  0xa2   : > { %2527 = vmatpush3.msra.mxu0 %v438_v22  ;;  %2604 = vmatprep.subr.mxu1 %v719_v62 }
  0xa3   : > { %2528 = vmatprep.subr.mxu0 %v437_v24  ;;  %2605 = vmatpush3.msra.mxu1 %v719_v62 }
  0xa4   : > { %2529 = vmatpush3.msra.mxu0 %v437_v24  ;;  %2606 = vmatprep.subr.mxu1 %v718_v63 }
  0xa5   : > { %2531 = vmatmul.mubr.f32.vlgmr.msra.gmra.mxu0 %v406_v26  ;;  %2607 = vmatpush3.msra.mxu1 %v718_v63 }
  0xa6   : > { %2533 = vmatprep.mubr.f32.mxu0 %v407_v28  ;;  %2608 = vmatprep.subr.mxu1 %v717_v1 }
  0xa7   : > { %2609 = vmatpush3.msra.mxu1 %v717_v1 }
  0xa9   : > { %2534 = vmatmul.mubr.f32.gmra.mxu0 %v408_v30 }
  0xaa   : > { %2536 = vmatprep.mubr.f32.mxu0 %v409_v32 }
  0xad   : > { %2537 = vmatmul.mubr.f32.gmra.mxu0 %v410_v34 }
  0xae   : > { %2539 = vmatprep.mubr.f32.mxu0 %v411_v35 }
  0xb1   : > { %2540 = vmatmul.mubr.f32.gmra.mxu0 %v412_v36 }
  0xb2   : > { %2542 = vmatprep.mubr.f32.mxu0 %v413_v37 }
  0xb5   : > { %2543 = vmatmul.mubr.f32.gmra.mxu0 %v414_v38 }
  0xb6   : > { %2545 = vmatprep.mubr.f32.mxu0 %v415_v39 }
  0xb9   : > { %2546 = vmatmul.mubr.f32.gmra.mxu0 %v416_v40 }
  0xba   : > { %2548 = vmatprep.mubr.f32.mxu0 %v417_v41 }
  0xbd   : > { %2549 = vmatmul.mubr.f32.gmra.mxu0 %v418_v42 }
  0xbe   : > { %2551 = vmatprep.mubr.f32.mxu0 %v419_v43 }
  0xc1   : > { %2552 = vmatmul.mubr.f32.gmra.mxu0 %v420_v44 }
  0xc2   : > { %2554 = vmatprep.mubr.f32.mxu0 %v421_v45 }
  0xc5   : > { %2555 = vmatmul.mubr.f32.gmra.mxu0 %v422_v46 }
  0xc6   : > { %2557 = vmatprep.mubr.f32.mxu0 %v423_v47 }
  0xc9   : > { %2558 = vmatmul.mubr.f32.gmra.mxu0 %v424_v48 }
  0xca   : > { %2560 = vmatprep.mubr.f32.mxu0 %v425_v49 }
  0xcd   : > { %2561 = vmatmul.mubr.f32.gmra.mxu0 %v426_v50 }
  0xce   : > { %2563 = vmatprep.mubr.f32.mxu0 %v427_v51 }
  0xd1   : > { %2564 = vmatmul.mubr.f32.gmra.mxu0 %v428_v52 }
  0xd2   : > { %2566 = vmatprep.mubr.f32.mxu0 %v429_v53 }
  0xd5   : > { %2567 = vmatmul.mubr.f32.gmra.mxu0 %v430_v54 }
  0xd6   : > { %2569 = vmatprep.mubr.f32.mxu0 %v431_v55 }
  0xd9   : > { %2570 = vmatmul.mubr.f32.gmra.mxu0 %v432_v56 }
  0xda   : > { %2572 = vmatprep.mubr.f32.mxu0 %v433_v57 }
  0xdd   : > { %2573 = vmatmul.mubr.f32.gmra.mxu0 %v434_v58 }
  0xde   : > { %2575 = vmatprep.mubr.f32.mxu0 %v435_v59 }
  0xe1   : > { %2576 = vmatmul.mubr.f32.gmra.mxu0 %v436_v60 }
 0x165   : > { %v2532_v3 = vpop.f32.mrf.mxu0 }
 0x166   : > { %v532_v4 = vadd.f32 %v2532_v3, %v3703_v2 }
 0x167   : > { %v526_v5 = vpop.f32.mrf.mxu0 }
 0x168   : > { %v527_v6 = vadd.f32 %v3703_v2, %v526_v5  ;;  %v686_v9 = vmax.f32 %v532_v4, 0.0 }
 0x169   : > { %v2535_v7 = vpop.f32.mrf.mxu0 }
 0x16a   : > { %v685_v8 = vmax.f32 %v527_v6, 0.0  ;;  %v542_v10 = vadd.f32 %v2535_v7, %v3703_v2 }
 0x16b   : > { %v536_v11 = vpop.f32.mrf.mxu0 }
 0x16c   : > { %v537_v12 = vadd.f32 %v3703_v2, %v536_v11  ;;  %2610 = vmatprep.mubr.f32.mxu1 %v685_v8  ;;  %v688_v16 = vmax.f32 %v542_v10, 0.0 }
 0x16d   : > { %v2538_v13 = vpop.f32.mrf.mxu0  ;;  %2611 = vmatmul.mubr.f32.vlgmr.msra.gmra.mxu1 %v686_v9 }
 0x16e   : > { %v687_v14 = vmax.f32 %v537_v12, 0.0  ;;  %v552_v15 = vadd.f32 %v2538_v13, %v3703_v2 }
 0x16f   : > { %v546_v17 = vpop.f32.mrf.mxu0 }
 0x170   : > { %v547_v18 = vadd.f32 %v3703_v2, %v546_v17  ;;  %2613 = vmatprep.mubr.f32.mxu1 %v687_v14  ;;  %v690_v19 = vmax.f32 %v552_v15, 0.0 }
 0x171   : > { %v2541_v20 = vpop.f32.mrf.mxu0  ;;  %2614 = vmatmul.mubr.f32.gmra.mxu1 %v688_v16 }
 0x172   : > { %v689_v21 = vmax.f32 %v547_v18, 0.0  ;;  %v562_v22 = vadd.f32 %v2541_v20, %v3703_v2 }
 0x173   : > { %v556_v23 = vpop.f32.mrf.mxu0 }
 0x174   : > { %v557_v24 = vadd.f32 %v3703_v2, %v556_v23  ;;  %2616 = vmatprep.mubr.f32.mxu1 %v689_v21  ;;  %v692_v25 = vmax.f32 %v562_v22, 0.0 }
 0x175   : > { %v2544_v26 = vpop.f32.mrf.mxu0  ;;  %2617 = vmatmul.mubr.f32.gmra.mxu1 %v690_v19 }
 0x176   : > { %v691_v27 = vmax.f32 %v557_v24, 0.0  ;;  %v572_v28 = vadd.f32 %v2544_v26, %v3703_v2 }
 0x177   : > { %v566_v29 = vpop.f32.mrf.mxu0 }
 0x178   : > { %v567_v30 = vadd.f32 %v3703_v2, %v566_v29  ;;  %2619 = vmatprep.mubr.f32.mxu1 %v691_v27  ;;  %v694_v31 = vmax.f32 %v572_v28, 0.0 }
 0x179   : > { %v2547_v32 = vpop.f32.mrf.mxu0  ;;  %2620 = vmatmul.mubr.f32.gmra.mxu1 %v692_v25 }
 0x17a   : > { %v693_v33 = vmax.f32 %v567_v30, 0.0  ;;  %v582_v34 = vadd.f32 %v2547_v32, %v3703_v2 }
 0x17b   : > { %v576_v35 = vpop.f32.mrf.mxu0 }
 0x17c   : > { %v577_v36 = vadd.f32 %v3703_v2, %v576_v35  ;;  %2622 = vmatprep.mubr.f32.mxu1 %v693_v33  ;;  %v696_v37 = vmax.f32 %v582_v34, 0.0 }
 0x17d   : > { %v2550_v38 = vpop.f32.mrf.mxu0  ;;  %2623 = vmatmul.mubr.f32.gmra.mxu1 %v694_v31 }
 0x17e   : > { %v695_v39 = vmax.f32 %v577_v36, 0.0  ;;  %v592_v40 = vadd.f32 %v2550_v38, %v3703_v2 }
 0x17f   : > { %v586_v41 = vpop.f32.mrf.mxu0 }
 0x180   : > { %v587_v42 = vadd.f32 %v3703_v2, %v586_v41  ;;  %2625 = vmatprep.mubr.f32.mxu1 %v695_v39  ;;  %v698_v43 = vmax.f32 %v592_v40, 0.0  ;;  %v3740_v40 = vld [vmem:[%s4563_s17] ss:$0 sm:$0xff] }
 0x181   : > { %v2553_v44 = vpop.f32.mrf.mxu0  ;;  %2626 = vmatmul.mubr.f32.gmra.mxu1 %v696_v37  ;;  %v966_v37 = vlaneseq }
 0x182   : > { %v697_v45 = vmax.f32 %v587_v42, 0.0  ;;  %v602_v46 = vadd.f32 %v2553_v44, %v3703_v2 }
 0x183   : > { %v596_v47 = vpop.f32.mrf.mxu0  ;;  %v967_v38 = vshrl.u32 %v966_v37, 7 }
 0x184   : > { %v597_v48 = vadd.f32 %v3703_v2, %v596_v47  ;;  %2628 = vmatprep.mubr.f32.mxu1 %v697_v45  ;;  %v700_v49 = vmax.f32 %v602_v46, 0.0 }
 0x185   : > { %v2556_v50 = vpop.f32.mrf.mxu0  ;;  %2629 = vmatmul.mubr.f32.gmra.mxu1 %v698_v43  ;;  %v968_v39 = vsub.s32 0, %v967_v38 }
 0x186   : > { %v699_v51 = vmax.f32 %v597_v48, 0.0  ;;  %v612_v52 = vadd.f32 %v2556_v50, %v3703_v2 }
 0x187   : > { %v606_v53 = vpop.f32.mrf.mxu0  ;;  %v3743_v41 = vrot.slane %v3696_v0, %v968_v39 }
 0x188   : > { %v607_v54 = vadd.f32 %v3703_v2, %v606_v53  ;;  %2631 = vmatprep.mubr.f32.mxu1 %v699_v51  ;;  %v702_v55 = vmax.f32 %v612_v52, 0.0 }
 0x189   : > { %v2559_v56 = vpop.f32.mrf.mxu0  ;;  %2632 = vmatmul.mubr.f32.gmra.mxu1 %v700_v49 }
 0x18a   : > { %v701_v57 = vmax.f32 %v607_v54, 0.0  ;;  %v622_v58 = vadd.f32 %v2559_v56, %v3703_v2 }
 0x18b   : > { %v616_v59 = vpop.f32.mrf.mxu0 }
 0x18c   : > { %v617_v60 = vadd.f32 %v3703_v2, %v616_v59  ;;  %2634 = vmatprep.mubr.f32.mxu1 %v701_v57  ;;  %v704_v61 = vmax.f32 %v622_v58, 0.0 }
 0x18d   : > { %v2562_v62 = vpop.f32.mrf.mxu0  ;;  %2635 = vmatmul.mubr.f32.gmra.mxu1 %v702_v55 }
 0x18e   : > { %v703_v63 = vmax.f32 %v617_v60, 0.0  ;;  %v632_v1 = vadd.f32 %v2562_v62, %v3703_v2 }
 0x18f   : > { %v626_v3 = vpop.f32.mrf.mxu0 }
 0x190   : > { %v627_v4 = vadd.f32 %v3703_v2, %v626_v3  ;;  %2637 = vmatprep.mubr.f32.mxu1 %v703_v63  ;;  %v706_v5 = vmax.f32 %v632_v1, 0.0 }
 0x191   : > { %v2565_v6 = vpop.f32.mrf.mxu0  ;;  %2638 = vmatmul.mubr.f32.gmra.mxu1 %v704_v61 }
 0x192   : > { %v705_v7 = vmax.f32 %v627_v4, 0.0  ;;  %v642_v8 = vadd.f32 %v2565_v6, %v3703_v2 }
 0x193   : > { %v636_v9 = vpop.f32.mrf.mxu0 }
 0x194   : > { %v637_v10 = vadd.f32 %v3703_v2, %v636_v9  ;;  %2640 = vmatprep.mubr.f32.mxu1 %v705_v7  ;;  %v708_v11 = vmax.f32 %v642_v8, 0.0 }
 0x195   : > { %v2568_v12 = vpop.f32.mrf.mxu0  ;;  %2641 = vmatmul.mubr.f32.gmra.mxu1 %v706_v5 }
 0x196   : > { %v707_v13 = vmax.f32 %v637_v10, 0.0  ;;  %v652_v14 = vadd.f32 %v2568_v12, %v3703_v2 }
 0x197   : > { %v646_v15 = vpop.f32.mrf.mxu0 }
 0x198   : > { %v647_v16 = vadd.f32 %v3703_v2, %v646_v15  ;;  %2643 = vmatprep.mubr.f32.mxu1 %v707_v13  ;;  %v710_v17 = vmax.f32 %v652_v14, 0.0 }
 0x199   : > { %v2571_v18 = vpop.f32.mrf.mxu0  ;;  %2644 = vmatmul.mubr.f32.gmra.mxu1 %v708_v11 }
 0x19a   : > { %v709_v19 = vmax.f32 %v647_v16, 0.0  ;;  %v662_v20 = vadd.f32 %v2571_v18, %v3703_v2 }
 0x19b   : > { %v656_v21 = vpop.f32.mrf.mxu0 }
 0x19c   : > { %v657_v22 = vadd.f32 %v3703_v2, %v656_v21  ;;  %2646 = vmatprep.mubr.f32.mxu1 %v709_v19  ;;  %v712_v23 = vmax.f32 %v662_v20, 0.0 }
 0x19d   : > { %v2574_v24 = vpop.f32.mrf.mxu0  ;;  %2647 = vmatmul.mubr.f32.gmra.mxu1 %v710_v17 }
 0x19e   : > { %v711_v25 = vmax.f32 %v657_v22, 0.0  ;;  %v672_v26 = vadd.f32 %v2574_v24, %v3703_v2 }
 0x19f   : > { %v666_v27 = vpop.f32.mrf.mxu0 }
 0x1a0   : > { %v667_v28 = vadd.f32 %v3703_v2, %v666_v27  ;;  %2649 = vmatprep.mubr.f32.mxu1 %v711_v25  ;;  %v714_v29 = vmax.f32 %v672_v26, 0.0 }
 0x1a1   : > { %v2577_v30 = vpop.f32.mrf.mxu0  ;;  %2650 = vmatmul.mubr.f32.gmra.mxu1 %v712_v23 }
 0x1a2   : > { %v713_v31 = vmax.f32 %v667_v28, 0.0  ;;  %v682_v32 = vadd.f32 %v2577_v30, %v3703_v2 }
 0x1a3   : > { %v676_v33 = vpop.f32.mrf.mxu0 }
 0x1a4   : > { %v677_v34 = vadd.f32 %v3703_v2, %v676_v33  ;;  %2652 = vmatprep.mubr.f32.mxu1 %v713_v31  ;;  %v716_v35 = vmax.f32 %v682_v32, 0.0 }
 0x1a5   : > { %2653 = vmatmul.mubr.f32.gmra.mxu1 %v714_v29 }
 0x1a6   : > { %v715_v36 = vmax.f32 %v677_v34, 0.0 }
 0x1a8   : > { %2655 = vmatprep.mubr.f32.mxu1 %v715_v36 }
 0x1a9   : > { %2656 = vmatmul.mubr.f32.gmra.mxu1 %v716_v35 }
 0x22d   : > { %v2612_v42 = vpop.f32.mrf.mxu1 }
 0x22e   : > { %v3746_v2 = vadd.f32 %v2612_v42, %v3740_v40 }
 0x22f   : > { %v806_v43 = vpop.f32.mrf.mxu1 }
 0x230   : > { %1357 = vst [vmem:[#allocation2 + $0x8] sm:$0xff] %v3746_v2  ;;  %v3750_v44 = vadd.f32 %v3740_v40, %v806_v43  ;;  %v972_v45 = vmul.f32 %v3743_v41, %v3746_v2 }
 0x231   : > { %v2615_v46 = vpop.f32.mrf.mxu1 }
 0x232   : > { %1356 = vst [vmem:[#allocation2] sm:$0xff] %v3750_v44  ;;  %v3756_v47 = vadd.f32 %v2615_v46, %v3740_v40  ;;  %1005 = vadd.xlane.f32.xlu0 %v972_v45  ;;  %v971_v51 = vmul.f32 %v3743_v41, %v3750_v44 }
 0x233   : > { %v816_v48 = vpop.f32.mrf.mxu1 }
 0x234   : > { %1359 = vst [vmem:[#allocation2 + $0x18] sm:$0xff] %v3756_v47  ;;  %v3760_v49 = vadd.f32 %v3740_v40, %v816_v48  ;;  %v974_v50 = vmul.f32 %v3743_v41, %v3756_v47 }
 0x235   : > { %v2618_v52 = vpop.f32.mrf.mxu1 }
 0x236   : > { %1358 = vst [vmem:[#allocation2 + $0x10] sm:$0xff] %v3760_v49  ;;  %v3768_v53 = vadd.f32 %v2618_v52, %v3740_v40  ;;  %1009 = vadd.xlane.f32.xlu1 %v974_v50  ;;  %1003 = vadd.xlane.f32.xlu0 %v971_v51  ;;  %v973_v56 = vmul.f32 %v3743_v41, %v3760_v49 }
 0x237   : > { %v826_v54 = vpop.f32.mrf.mxu1 }
 0x238   : > { %1361 = vst [vmem:[#allocation2 + $0x28] sm:$0xff] %v3768_v53  ;;  %v3772_v55 = vadd.f32 %v3740_v40, %v826_v54  ;;  %v976_v62 = vmul.f32 %v3743_v41, %v3768_v53 }
 0x239   : > { %v2621_v57 = vpop.f32.mrf.mxu1 }
 0x23a   : > { %1360 = vst [vmem:[#allocation2 + $0x20] sm:$0xff] %v3772_v55  ;;  %v3778_v58 = vadd.f32 %v2621_v57, %v3740_v40  ;;  %1007 = vadd.xlane.f32.xlu1 %v973_v56  ;;  %v975_v59 = vmul.f32 %v3743_v41, %v3772_v55 }
 0x23b   : > { %v836_v60 = vpop.f32.mrf.mxu1 }
 0x23c   : > { %1363 = vst [vmem:[#allocation2 + $0x38] sm:$0xff] %v3778_v58  ;;  %v3784_v61 = vadd.f32 %v3740_v40, %v836_v60  ;;  %1011 = vadd.xlane.f32.xlu0 %v975_v59  ;;  %v978_v6 = vmul.f32 %v3743_v41, %v3778_v58 }
 0x23d   : > { %v2624_v63 = vpop.f32.mrf.mxu1 }
 0x23e   : > { %1362 = vst [vmem:[#allocation2 + $0x30] sm:$0xff] %v3784_v61  ;;  %v3790_v1 = vadd.f32 %v2624_v63, %v3740_v40  ;;  %1013 = vadd.xlane.f32.xlu1 %v976_v62  ;;  %v977_v3 = vmul.f32 %v3743_v41, %v3784_v61 }
 0x23f   : > { %v846_v4 = vpop.f32.mrf.mxu1 }
 0x240   : > { %1365 = vst [vmem:[#allocation2 + $0x48] sm:$0xff] %v3790_v1  ;;  %v3796_v5 = vadd.f32 %v3740_v40, %v846_v4  ;;  %1015 = vadd.xlane.f32.xlu0 %v977_v3  ;;  %v980_v12 = vmul.f32 %v3743_v41, %v3790_v1 }
 0x241   : > { %v2627_v7 = vpop.f32.mrf.mxu1 }
 0x242   : > { %1364 = vst [vmem:[#allocation2 + $0x40] sm:$0xff] %v3796_v5  ;;  %v3802_v8 = vadd.f32 %v2627_v7, %v3740_v40  ;;  %1017 = vadd.xlane.f32.xlu1 %v978_v6  ;;  %v979_v9 = vmul.f32 %v3743_v41, %v3796_v5 }
 0x243   : > { %v856_v10 = vpop.f32.mrf.mxu1 }
 0x244   : > { %1367 = vst [vmem:[#allocation2 + $0x58] sm:$0xff] %v3802_v8  ;;  %v3808_v11 = vadd.f32 %v3740_v40, %v856_v10  ;;  %1019 = vadd.xlane.f32.xlu0 %v979_v9  ;;  %v982_v18 = vmul.f32 %v3743_v41, %v3802_v8 }
 0x245   : > { %v2630_v13 = vpop.f32.mrf.mxu1 }
 0x246   : > { %1366 = vst [vmem:[#allocation2 + $0x50] sm:$0xff] %v3808_v11  ;;  %v3814_v14 = vadd.f32 %v2630_v13, %v3740_v40  ;;  %1021 = vadd.xlane.f32.xlu1 %v980_v12  ;;  %v981_v15 = vmul.f32 %v3743_v41, %v3808_v11 }
 0x247   : > { %v866_v16 = vpop.f32.mrf.mxu1 }
 0x248   : > { %1369 = vst [vmem:[#allocation2 + $0x68] sm:$0xff] %v3814_v14  ;;  %v3820_v17 = vadd.f32 %v3740_v40, %v866_v16  ;;  %1023 = vadd.xlane.f32.xlu0 %v981_v15  ;;  %v984_v24 = vmul.f32 %v3743_v41, %v3814_v14 }
 0x249   : > { %v2633_v19 = vpop.f32.mrf.mxu1 }
 0x24a   : > { %1368 = vst [vmem:[#allocation2 + $0x60] sm:$0xff] %v3820_v17  ;;  %v3826_v20 = vadd.f32 %v2633_v19, %v3740_v40  ;;  %1025 = vadd.xlane.f32.xlu1 %v982_v18  ;;  %v983_v21 = vmul.f32 %v3743_v41, %v3820_v17 }
 0x24b   : > { %v876_v22 = vpop.f32.mrf.mxu1 }
 0x24c   : > { %1371 = vst [vmem:[#allocation2 + $0x78] sm:$0xff] %v3826_v20  ;;  %v3832_v23 = vadd.f32 %v3740_v40, %v876_v22  ;;  %1027 = vadd.xlane.f32.xlu0 %v983_v21  ;;  %v986_v30 = vmul.f32 %v3743_v41, %v3826_v20 }
 0x24d   : > { %v2636_v25 = vpop.f32.mrf.mxu1 }
 0x24e   : > { %1370 = vst [vmem:[#allocation2 + $0x70] sm:$0xff] %v3832_v23  ;;  %v3838_v26 = vadd.f32 %v2636_v25, %v3740_v40  ;;  %1029 = vadd.xlane.f32.xlu1 %v984_v24  ;;  %v985_v27 = vmul.f32 %v3743_v41, %v3832_v23 }
 0x24f   : > { %v886_v28 = vpop.f32.mrf.mxu1 }
 0x250   : > { %1373 = vst [vmem:[#allocation2 + $0x88] sm:$0xff] %v3838_v26  ;;  %v3844_v29 = vadd.f32 %v3740_v40, %v886_v28  ;;  %1031 = vadd.xlane.f32.xlu0 %v985_v27  ;;  %v988_v36 = vmul.f32 %v3743_v41, %v3838_v26 }
 0x251   : > { %v2639_v31 = vpop.f32.mrf.mxu1 }
 0x252   : > { %1372 = vst [vmem:[#allocation2 + $0x80] sm:$0xff] %v3844_v29  ;;  %v3850_v32 = vadd.f32 %v2639_v31, %v3740_v40  ;;  %1033 = vadd.xlane.f32.xlu1 %v986_v30  ;;  %v987_v33 = vmul.f32 %v3743_v41, %v3844_v29 }
 0x253   : > { %v896_v34 = vpop.f32.mrf.mxu1 }
 0x254   : > { %1375 = vst [vmem:[#allocation2 + $0x98] sm:$0xff] %v3850_v32  ;;  %v3856_v35 = vadd.f32 %v3740_v40, %v896_v34  ;;  %1035 = vadd.xlane.f32.xlu0 %v987_v33  ;;  %v990_v45 = vmul.f32 %v3743_v41, %v3850_v32  ;;  %v3938_v33 = vstv %s3686_s24 }
 0x255   : > { %v2642_v37 = vpop.f32.mrf.mxu1 }
 0x256   : > { %1374 = vst [vmem:[#allocation2 + $0x90] sm:$0xff] %v3856_v35  ;;  %v3862_v38 = vadd.f32 %v2642_v37, %v3740_v40  ;;  %1037 = vadd.xlane.f32.xlu1 %v988_v36  ;;  %v989_v39 = vmul.f32 %v3743_v41, %v3856_v35 }
 0x257   : > { %v906_v42 = vpop.f32.mrf.mxu1 }
 0x258   : > { %1377 = vst [vmem:[#allocation2 + $0xa8] sm:$0xff] %v3862_v38  ;;  %v3868_v43 = vadd.f32 %v3740_v40, %v906_v42  ;;  %1039 = vadd.xlane.f32.xlu0 %v989_v39  ;;  %v992_v54 = vmul.f32 %v3743_v41, %v3862_v38 }
 0x259   : > { %v2645_v46 = vpop.f32.mrf.mxu1 }
 0x25a   : > { %1376 = vst [vmem:[#allocation2 + $0xa0] sm:$0xff] %v3868_v43  ;;  %v3874_v48 = vadd.f32 %v2645_v46, %v3740_v40  ;;  %1041 = vadd.xlane.f32.xlu1 %v990_v45  ;;  %v991_v50 = vmul.f32 %v3743_v41, %v3868_v43 }
 0x25b   : > { %v916_v51 = vpop.f32.mrf.mxu1 }
 0x25c   : > { %1379 = vst [vmem:[#allocation2 + $0xb8] sm:$0xff] %v3874_v48  ;;  %v3880_v52 = vadd.f32 %v3740_v40, %v916_v51  ;;  %1043 = vadd.xlane.f32.xlu0 %v991_v50  ;;  %v994_v63 = vmul.f32 %v3743_v41, %v3874_v48 }
 0x25d   : > { %v2648_v56 = vpop.f32.mrf.mxu1 }
 0x25e   : > { %1378 = vst [vmem:[#allocation2 + $0xb0] sm:$0xff] %v3880_v52  ;;  %v3886_v57 = vadd.f32 %v2648_v56, %v3740_v40  ;;  %1045 = vadd.xlane.f32.xlu1 %v992_v54  ;;  %v993_v59 = vmul.f32 %v3743_v41, %v3880_v52 }
 0x25f   : > { %v926_v60 = vpop.f32.mrf.mxu1 }
 0x260   : > { %1381 = vst [vmem:[#allocation2 + $0xc8] sm:$0xff] %v3886_v57  ;;  %v3892_v62 = vadd.f32 %v3740_v40, %v926_v60  ;;  %1047 = vadd.xlane.f32.xlu0 %v993_v59  ;;  %v996_v10 = vmul.f32 %v3743_v41, %v3886_v57 }
 0x261   : > { %v2651_v3 = vpop.f32.mrf.mxu1 }
 0x262   : > { %1380 = vst [vmem:[#allocation2 + $0xc0] sm:$0xff] %v3892_v62  ;;  %v3898_v4 = vadd.f32 %v2651_v3, %v3740_v40  ;;  %1049 = vadd.xlane.f32.xlu1 %v994_v63  ;;  %v995_v6 = vmul.f32 %v3743_v41, %v3892_v62 }
 0x263   : > { %v936_v7 = vpop.f32.mrf.mxu1 }
 0x264   : > { %1383 = vst [vmem:[#allocation2 + $0xd8] sm:$0xff] %v3898_v4  ;;  %v3904_v9 = vadd.f32 %v3740_v40, %v936_v7  ;;  %1051 = vadd.xlane.f32.xlu0 %v995_v6  ;;  %v998_v19 = vmul.f32 %v3743_v41, %v3898_v4 }
 0x265   : > { %v2654_v12 = vpop.f32.mrf.mxu1 }
 0x266   : > { %1382 = vst [vmem:[#allocation2 + $0xd0] sm:$0xff] %v3904_v9  ;;  %v3910_v13 = vadd.f32 %v2654_v12, %v3740_v40  ;;  %1053 = vadd.xlane.f32.xlu1 %v996_v10  ;;  %v997_v15 = vmul.f32 %v3743_v41, %v3904_v9 }
 0x267   : > { %v946_v16 = vpop.f32.mrf.mxu1 }
 0x268   : > { %1385 = vst [vmem:[#allocation2 + $0xe8] sm:$0xff] %v3910_v13  ;;  %v3916_v18 = vadd.f32 %v3740_v40, %v946_v16  ;;  %1055 = vadd.xlane.f32.xlu0 %v997_v15  ;;  %v1000_v28 = vmul.f32 %v3743_v41, %v3910_v13 }
 0x269   : > { %v2657_v21 = vpop.f32.mrf.mxu1 }
 0x26a   : > { %1384 = vst [vmem:[#allocation2 + $0xe0] sm:$0xff] %v3916_v18  ;;  %v3922_v22 = vadd.f32 %v2657_v21, %v3740_v40  ;;  %1057 = vadd.xlane.f32.xlu1 %v998_v19  ;;  %v999_v24 = vmul.f32 %v3743_v41, %v3916_v18 }
 0x26b   : > { %v956_v25 = vpop.f32.mrf.mxu1 }
 0x26c   : > { %1387 = vst [vmem:[#allocation2 + $0xf8] sm:$0xff] %v3922_v22  ;;  %v3928_v27 = vadd.f32 %v3740_v40, %v956_v25  ;;  %1059 = vadd.xlane.f32.xlu0 %v999_v24  ;;  %v1002_v31 = vmul.f32 %v3743_v41, %v3922_v22 }
 0x26e   : > { %1386 = vst [vmem:[#allocation2 + $0xf0] sm:$0xff] %v3928_v27  ;;  %1061 = vadd.xlane.f32.xlu1 %v1000_v28  ;;  %v1001_v30 = vmul.f32 %v3743_v41, %v3928_v27 }
 0x270   : > { %1063 = vadd.xlane.f32.xlu0 %v1001_v30 }
 0x272   : > { %1065 = vadd.xlane.f32.xlu1 %v1002_v31 }
 0x2bb   : > { %v1006_v34 = vpop.xlane.xlu0 %1005 }
 0x2bc   : > { %v1069_v40 = vadd.f32 %v3938_v33, %v1006_v34 }
 0x2be   : > { %v2309_v36 = vmul.f32 -1.442695, %v1069_v40 }
 0x2bf   : > { %v1010_v37 = vpop.xlane.xlu1 %1009  ;;  %v1004_v39 = vpop.xlane.xlu0 %1003 }
 0x2c0   : > { %2901 = vpow2.f32 %v2309_v36  ;;  %v1071_v42 = vadd.f32 %v3938_v33, %v1010_v37  ;;  %v1068_v45 = vadd.f32 %v3938_v33, %v1004_v39 }
 0x2c2   : > { %v2311_v46 = vmul.f32 -1.442695, %v1071_v42  ;;  %v2308_v50 = vmul.f32 -1.442695, %v1068_v45 }
 0x2c3   : > { %v1008_v51 = vpop.xlane.xlu1 %1007 }
 0x2c4   : > { %2903 = vpow2.f32 %v2311_v46  ;;  %v1070_v41 = vadd.f32 %v3938_v33, %v1008_v51 }
 0x2c5   : > { %2905 = vpow2.f32 %v2308_v50  ;;  %v1012_v54 = vpop.xlane.xlu0 %1011 }
 0x2c6   : > { %v2310_v56 = vmul.f32 -1.442695, %v1070_v41  ;;  %v1072_v59 = vadd.f32 %v3938_v33, %v1012_v54 }
 0x2c7   : > { %v1014_v60 = vpop.xlane.xlu1 %1013 }
 0x2c8   : > { %2907 = vpow2.f32 %v2310_v56  ;;  %v2312_v63 = vmul.f32 -1.442695, %v1072_v59  ;;  %v1073_v3 = vadd.f32 %v3938_v33, %v1014_v60 }
 0x2c9   : > { %v1016_v6 = vpop.xlane.xlu0 %1015 }
 0x2ca   : > { %2909 = vpow2.f32 %v2312_v63  ;;  %v2313_v7 = vmul.f32 -1.442695, %v1073_v3  ;;  %v1074_v10 = vadd.f32 %v3938_v33, %v1016_v6 }
 0x2cb   : > { %v1018_v12 = vpop.xlane.xlu1 %1017 }
 0x2cc   : > { %2911 = vpow2.f32 %v2313_v7  ;;  %v2314_v15 = vmul.f32 -1.442695, %v1074_v10  ;;  %v1075_v16 = vadd.f32 %v3938_v33, %v1018_v12 }
 0x2cd   : > { %v2902_v19 = vpop.eup %2901  ;;  %v1020_v21 = vpop.xlane.xlu0 %1019 }
 0x2ce   : > { %v1197_v24 = vadd.f32 1.0, %v2902_v19  ;;  %2913 = vpow2.f32 %v2314_v15  ;;  %v2315_v25 = vmul.f32 -1.442695, %v1075_v16  ;;  %v1076_v28 = vadd.f32 %v3938_v33, %v1020_v21 }
 0x2cf   : > { %v1022_v30 = vpop.xlane.xlu1 %1021 }
 0x2d0   : > { %2915 = vrcp.f32 %v1197_v24  ;;  %v2316_v31 = vmul.f32 -1.442695, %v1076_v28  ;;  %v1077_v34 = vadd.f32 %v3938_v33, %v1022_v30 }
 0x2d1   : > { %v2904_v40 = vpop.eup %2903  ;;  %2917 = vpow2.f32 %v2315_v25  ;;  %v1024_v36 = vpop.xlane.xlu0 %1023 }
 0x2d2   : > { %v2906_v37 = vpop.eup %2905  ;;  %v1199_v39 = vadd.f32 1.0, %v2904_v40  ;;  %2919 = vpow2.f32 %v2316_v31  ;;  %v2317_v42 = vmul.f32 -1.442695, %v1077_v34  ;;  %v1078_v45 = vadd.f32 %v3938_v33, %v1024_v36 }
 0x2d3   : > { %v1196_v46 = vadd.f32 1.0, %v2906_v37  ;;  %v1026_v50 = vpop.xlane.xlu1 %1025 }
 0x2d4   : > { %2921 = vrcp.f32 %v1199_v39  ;;  %v2318_v51 = vmul.f32 -1.442695, %v1078_v45  ;;  %v1079_v41 = vadd.f32 %v3938_v33, %v1026_v50 }
 0x2d5   : > { %v2908_v54 = vpop.eup %2907  ;;  %2923 = vrcp.f32 %v1196_v46  ;;  %v1028_v56 = vpop.xlane.xlu0 %1027 }
 0x2d6   : > { %v1198_v59 = vadd.f32 1.0, %v2908_v54  ;;  %2925 = vpow2.f32 %v2317_v42  ;;  %v2319_v60 = vmul.f32 -1.442695, %v1079_v41  ;;  %v1080_v63 = vadd.f32 %v3938_v33, %v1028_v56 }
 0x2d7   : > { %v2910_v3 = vpop.eup %2909  ;;  %2927 = vpow2.f32 %v2318_v51  ;;  %v1030_v6 = vpop.xlane.xlu1 %1029 }
 0x2d8   : > { %2929 = vrcp.f32 %v1198_v59  ;;  %v1200_v7 = vadd.f32 1.0, %v2910_v3  ;;  %v2320_v10 = vmul.f32 -1.442695, %v1080_v63  ;;  %v1081_v12 = vadd.f32 %v3938_v33, %v1030_v6 }
 0x2d9   : > { %v2912_v15 = vpop.eup %2911  ;;  %2931 = vpow2.f32 %v2319_v60  ;;  %v1032_v16 = vpop.xlane.xlu0 %1031 }
 0x2da   : > { %2933 = vrcp.f32 %v1200_v7  ;;  %v1201_v19 = vadd.f32 1.0, %v2912_v15  ;;  %v2321_v21 = vmul.f32 -1.442695, %v1081_v12  ;;  %v1082_v24 = vadd.f32 %v3938_v33, %v1032_v16 }
 0x2db   : > { %v2914_v25 = vpop.eup %2913  ;;  %2935 = vpow2.f32 %v2320_v10  ;;  %v1034_v28 = vpop.xlane.xlu1 %1033 }
 0x2dc   : > { %2937 = vrcp.f32 %v1201_v19  ;;  %v1202_v30 = vadd.f32 1.0, %v2914_v25  ;;  %v2322_v31 = vmul.f32 -1.442695, %v1082_v24  ;;  %v1083_v34 = vadd.f32 %v3938_v33, %v1034_v28 }
 0x2dd   : > { %v2916_v40 = vpop.eup %2915  ;;  %2939 = vpow2.f32 %v2321_v21  ;;  %v1036_v36 = vpop.xlane.xlu0 %1035 }
 0x2de   : > { %v2918_v37 = vpop.eup %2917  ;;  %v1293_v39 = vmul.f32 %v2916_v40, %v3746_v2  ;;  %2941 = vrcp.f32 %v1202_v30  ;;  %v2323_v42 = vmul.f32 -1.442695, %v1083_v34  ;;  %v1084_v45 = vadd.f32 %v3938_v33, %v1036_v36 }
 0x2df   : > { %v2920_v46 = vpop.eup %2919  ;;  %v1203_v50 = vadd.f32 1.0, %v2918_v37  ;;  %2943 = vpow2.f32 %v2322_v31  ;;  %v1038_v51 = vpop.xlane.xlu1 %1037 }
 0x2e0   : > { %1325 = vst [vmem:[#allocation4 + $0x8] sm:$0xff] %v1293_v39  ;;  %v1204_v41 = vadd.f32 1.0, %v2920_v46  ;;  %2945 = vpow2.f32 %v2323_v42  ;;  %v2324_v54 = vmul.f32 -1.442695, %v1084_v45  ;;  %v1085_v56 = vadd.f32 %v3938_v33, %v1038_v51 }
 0x2e1   : > { %v2922_v59 = vpop.eup %2921  ;;  %2947 = vrcp.f32 %v1203_v50  ;;  %v1040_v60 = vpop.xlane.xlu0 %1039 }
 0x2e2   : > { %v2924_v63 = vpop.eup %2923  ;;  %v1295_v2 = vmul.f32 %v2922_v59, %v3756_v47  ;;  %2949 = vrcp.f32 %v1204_v41  ;;  %v2325_v3 = vmul.f32 -1.442695, %v1085_v56  ;;  %v1086_v6 = vadd.f32 %v3938_v33, %v1040_v60 }
 0x2e3   : > { %v2926_v7 = vpop.eup %2925  ;;  %v1292_v10 = vmul.f32 %v2924_v63, %v3750_v44  ;;  %2951 = vpow2.f32 %v2324_v54  ;;  %v1042_v12 = vpop.xlane.xlu1 %1041 }
 0x2e4   : > { %v2928_v15 = vpop.eup %2927  ;;  %1327 = vst [vmem:[#allocation4 + $0x18] sm:$0xff] %v1295_v2  ;;  %v1205_v16 = vadd.f32 1.0, %v2926_v7  ;;  %2953 = vpow2.f32 %v2325_v3  ;;  %v2326_v19 = vmul.f32 -1.442695, %v1086_v6  ;;  %v1087_v21 = vadd.f32 %v3938_v33, %v1042_v12 }
 0x2e5   : > { %v2930_v24 = vpop.eup %2929  ;;  %1324 = vst [vmem:[#allocation4] sm:$0xff] %v1292_v10  ;;  %v1206_v25 = vadd.f32 1.0, %v2928_v15  ;;  %v1044_v47 = vpop.xlane.xlu0 %1043 }
 0x2e6   : > { %v2932_v28 = vpop.eup %2931  ;;  %v1294_v30 = vmul.f32 %v2930_v24, %v3760_v49  ;;  %2955 = vrcp.f32 %v1205_v16  ;;  %v2327_v31 = vmul.f32 -1.442695, %v1087_v21  ;;  %v1088_v44 = vadd.f32 %v3938_v33, %v1044_v47 }
 0x2e7   : > { %v2934_v34 = vpop.eup %2933  ;;  %2957 = vrcp.f32 %v1206_v25  ;;  %v1207_v40 = vadd.f32 1.0, %v2932_v28  ;;  %v1046_v36 = vpop.xlane.xlu1 %1045 }
 0x2e8   : > { %v2936_v37 = vpop.eup %2935  ;;  %1326 = vst [vmem:[#allocation4 + $0x10] sm:$0xff] %v1294_v30  ;;  %v1296_v39 = vmul.f32 %v2934_v34, %v3772_v55  ;;  %2959 = vpow2.f32 %v2326_v19  ;;  %v2328_v42 = vmul.f32 -1.442695, %v1088_v44  ;;  %v1089_v45 = vadd.f32 %v3938_v33, %v1046_v36 }
 0x2e9   : > { %v2938_v46 = vpop.eup %2937  ;;  %2961 = vrcp.f32 %v1207_v40  ;;  %v1208_v50 = vadd.f32 1.0, %v2936_v37  ;;  %v1048_v49 = vpop.xlane.xlu0 %1047 }
 0x2ea   : > { %v2940_v51 = vpop.eup %2939  ;;  %1328 = vst [vmem:[#allocation4 + $0x20] sm:$0xff] %v1296_v39  ;;  %v1297_v41 = vmul.f32 %v2938_v46, %v3768_v53  ;;  %2963 = vpow2.f32 %v2327_v31  ;;  %v2329_v54 = vmul.f32 -1.442695, %v1089_v45  ;;  %v1090_v56 = vadd.f32 %v3938_v33, %v1048_v49 }
 0x2eb   : > { %v2942_v59 = vpop.eup %2941  ;;  %2965 = vrcp.f32 %v1208_v50  ;;  %v1209_v60 = vadd.f32 1.0, %v2940_v51  ;;  %v1050_v55 = vpop.xlane.xlu1 %1049 }
 0x2ec   : > { %v2944_v63 = vpop.eup %2943  ;;  %1329 = vst [vmem:[#allocation4 + $0x28] sm:$0xff] %v1297_v41  ;;  %v1298_v2 = vmul.f32 %v2942_v59, %v3784_v61  ;;  %2967 = vpow2.f32 %v2328_v42  ;;  %v1091_v3 = vadd.f32 %v3938_v33, %v1050_v55  ;;  %v2330_v10 = vmul.f32 -1.442695, %v1090_v56 }
 0x2ed   : > { %v2946_v6 = vpop.eup %2945  ;;  %2969 = vrcp.f32 %v1209_v60  ;;  %v1210_v7 = vadd.f32 1.0, %v2944_v63  ;;  %v1052_v53 = vpop.xlane.xlu0 %1051 }
 0x2ee   : > { %v2948_v12 = vpop.eup %2947  ;;  %1330 = vst [vmem:[#allocation4 + $0x30] sm:$0xff] %v1298_v2  ;;  %v1211_v15 = vadd.f32 1.0, %v2946_v6  ;;  %2971 = vpow2.f32 %v2329_v54  ;;  %v2331_v16 = vmul.f32 -1.442695, %v1091_v3  ;;  %v1092_v19 = vadd.f32 %v3938_v33, %v1052_v53 }
 0x2ef   : > { %v2950_v21 = vpop.eup %2949  ;;  %v1299_v24 = vmul.f32 %v2948_v12, %v3778_v58  ;;  %2973 = vrcp.f32 %v1210_v7  ;;  %v1054_v61 = vpop.xlane.xlu1 %1053 }
 0x2f0   : > { %v2952_v25 = vpop.eup %2951  ;;  %v1300_v47 = vmul.f32 %v2950_v21, %v3796_v5  ;;  %2975 = vrcp.f32 %v1211_v15  ;;  %v1093_v28 = vadd.f32 %v3938_v33, %v1054_v61  ;;  %v2332_v44 = vmul.f32 -1.442695, %v1092_v19 }
 0x2f1   : > { %v2954_v30 = vpop.eup %2953  ;;  %1331 = vst [vmem:[#allocation4 + $0x38] sm:$0xff] %v1299_v24  ;;  %v1212_v31 = vadd.f32 1.0, %v2952_v25  ;;  %2977 = vpow2.f32 %v2330_v10  ;;  %v1056_v34 = vpop.xlane.xlu0 %1055 }
 0x2f2   : > { %1332 = vst [vmem:[#allocation4 + $0x40] sm:$0xff] %v1300_v47  ;;  %v1213_v40 = vadd.f32 1.0, %v2954_v30  ;;  %2979 = vpow2.f32 %v2331_v16  ;;  %v2333_v36 = vmul.f32 -1.442695, %v1093_v28  ;;  %v1094_v58 = vadd.f32 %v3938_v33, %v1056_v34 }
 0x2f3   : > { %v2956_v37 = vpop.eup %2955  ;;  %2981 = vrcp.f32 %v1212_v31  ;;  %v1058_v39 = vpop.xlane.xlu1 %1057 }
 0x2f4   : > { %v2958_v42 = vpop.eup %2957  ;;  %v1301_v5 = vmul.f32 %v2956_v37, %v3790_v1  ;;  %2983 = vrcp.f32 %v1213_v40  ;;  %v2334_v45 = vmul.f32 -1.442695, %v1094_v58  ;;  %v1095_v46 = vadd.f32 %v3938_v33, %v1058_v39 }
 0x2f5   : > { %v2960_v50 = vpop.eup %2959  ;;  %v1302_v49 = vmul.f32 %v2958_v42, %v3808_v11  ;;  %2985 = vpow2.f32 %v2332_v44  ;;  %v1060_v51 = vpop.xlane.xlu0 %1059 }
 0x2f6   : > { %v2962_v41 = vpop.eup %2961  ;;  %1333 = vst [vmem:[#allocation4 + $0x48] sm:$0xff] %v1301_v5  ;;  %v1214_v54 = vadd.f32 1.0, %v2960_v50  ;;  %2987 = vpow2.f32 %v2333_v36  ;;  %v2335_v56 = vmul.f32 -1.442695, %v1095_v46  ;;  %v1096_v59 = vadd.f32 %v3938_v33, %v1060_v51 }
 0x2f7   : > { %v2964_v60 = vpop.eup %2963  ;;  %1334 = vst [vmem:[#allocation4 + $0x50] sm:$0xff] %v1302_v49  ;;  %v1303_v1 = vmul.f32 %v2962_v41, %v3802_v8  ;;  %2989 = vpow2.f32 %v2334_v45  ;;  %v1062_v55 = vpop.xlane.xlu1 %1061 }
 0x2f8   : > { %v2966_v63 = vpop.eup %2965  ;;  %2991 = vrcp.f32 %v1214_v54  ;;  %v1215_v2 = vadd.f32 1.0, %v2964_v60  ;;  %v2336_v3 = vmul.f32 -1.442695, %v1096_v59  ;;  %v1097_v11 = vadd.f32 %v3938_v33, %v1062_v55 }
 0x2f9   : > { %v2968_v6 = vpop.eup %2967  ;;  %1335 = vst [vmem:[#allocation4 + $0x58] sm:$0xff] %v1303_v1  ;;  %v1304_v7 = vmul.f32 %v2966_v63, %v3820_v17  ;;  %2993 = vpow2.f32 %v2335_v56  ;;  %v1064_v10 = vpop.xlane.xlu0 %1063 }
 0x2fa   : > { %v2970_v53 = vpop.eup %2969  ;;  %2995 = vrcp.f32 %v1215_v2  ;;  %v1216_v12 = vadd.f32 1.0, %v2968_v6  ;;  %v2337_v15 = vmul.f32 -1.442695, %v1097_v11  ;;  %v1098_v8 = vadd.f32 %v3938_v33, %v1064_v10 }
 0x2fb   : > { %v2972_v16 = vpop.eup %2971  ;;  %1336 = vst [vmem:[#allocation4 + $0x60] sm:$0xff] %v1304_v7  ;;  %v1305_v19 = vmul.f32 %v2970_v53, %v3814_v14  ;;  %2997 = vpow2.f32 %v2336_v3  ;;  %v1066_v21 = vpop.xlane.xlu1 %1065 }
 0x2fc   : > { %v2974_v24 = vpop.eup %2973  ;;  %2999 = vrcp.f32 %v1216_v12  ;;  %v1217_v61 = vadd.f32 1.0, %v2972_v16  ;;  %v2338_v25 = vmul.f32 -1.442695, %v1098_v8  ;;  %v1099_v17 = vadd.f32 %v3938_v33, %v1066_v21 }
 0x2fd   : > { %v2976_v47 = vpop.eup %2975  ;;  %1337 = vst [vmem:[#allocation4 + $0x68] sm:$0xff] %v1305_v19  ;;  %v1306_v28 = vmul.f32 %v2974_v24, %v3832_v23  ;;  %3001 = vpow2.f32 %v2337_v15 }
 0x2fe   : > { %v2978_v30 = vpop.eup %2977  ;;  %v1307_v31 = vmul.f32 %v2976_v47, %v3826_v20  ;;  %3003 = vrcp.f32 %v1217_v61  ;;  %v2339_v44 = vmul.f32 -1.442695, %v1099_v17 }
 0x2ff   : > { %v2980_v34 = vpop.eup %2979  ;;  %1338 = vst [vmem:[#allocation4 + $0x70] sm:$0xff] %v1306_v28  ;;  %v1218_v14 = vadd.f32 1.0, %v2978_v30  ;;  %3005 = vpow2.f32 %v2338_v25 }
 0x300   : > { %v2982_v40 = vpop.eup %2981  ;;  %1339 = vst [vmem:[#allocation4 + $0x78] sm:$0xff] %v1307_v31  ;;  %v1219_v36 = vadd.f32 1.0, %v2980_v34  ;;  %3007 = vpow2.f32 %v2339_v44 }
 0x301   : > { %v2984_v58 = vpop.eup %2983  ;;  %v1308_v33 = vmul.f32 %v2982_v40, %v3844_v29  ;;  %3009 = vrcp.f32 %v1218_v14 }
 0x302   : > { %v2986_v37 = vpop.eup %2985  ;;  %v1309_v23 = vmul.f32 %v2984_v58, %v3838_v26  ;;  %3011 = vrcp.f32 %v1219_v36 }
 0x303   : > { %v2988_v39 = vpop.eup %2987  ;;  %1340 = vst [vmem:[#allocation4 + $0x80] sm:$0xff] %v1308_v33  ;;  %v1220_v20 = vadd.f32 1.0, %v2986_v37 }
 0x304   : > { %v2990_v42 = vpop.eup %2989  ;;  %1341 = vst [vmem:[#allocation4 + $0x88] sm:$0xff] %v1309_v23  ;;  %v1221_v5 = vadd.f32 1.0, %v2988_v39 }
 0x305   : > { %v2992_v45 = vpop.eup %2991  ;;  %3013 = vrcp.f32 %v1220_v20  ;;  %v1222_v46 = vadd.f32 1.0, %v2990_v42 }
 0x306   : > { %v2994_v50 = vpop.eup %2993  ;;  %v1310_v49 = vmul.f32 %v2992_v45, %v3856_v35  ;;  %3015 = vrcp.f32 %v1221_v5 }
 0x307   : > { %v2996_v51 = vpop.eup %2995  ;;  %3017 = vrcp.f32 %v1222_v46  ;;  %v1223_v29 = vadd.f32 1.0, %v2994_v50 }
 0x308   : > { %v2998_v41 = vpop.eup %2997  ;;  %1342 = vst [vmem:[#allocation4 + $0x90] sm:$0xff] %v1310_v49  ;;  %v1311_v26 = vmul.f32 %v2996_v51, %v3850_v32 }
 0x309   : > { %v3000_v54 = vpop.eup %2999  ;;  %3019 = vrcp.f32 %v1223_v29  ;;  %v1224_v56 = vadd.f32 1.0, %v2998_v41 }
 0x30a   : > { %v3002_v59 = vpop.eup %3001  ;;  %1343 = vst [vmem:[#allocation4 + $0x98] sm:$0xff] %v1311_v26  ;;  %v1312_v60 = vmul.f32 %v3000_v54, %v3868_v43 }
 0x30b   : > { %v3004_v1 = vpop.eup %3003  ;;  %3021 = vrcp.f32 %v1224_v56  ;;  %v1225_v55 = vadd.f32 1.0, %v3002_v59 }
 0x30c   : > { %v3006_v63 = vpop.eup %3005  ;;  %1344 = vst [vmem:[#allocation4 + $0xa0] sm:$0xff] %v1312_v60  ;;  %v1313_v35 = vmul.f32 %v3004_v1, %v3862_v38 }
 0x30d   : > { %v3008_v2 = vpop.eup %3007  ;;  %3023 = vrcp.f32 %v1225_v55  ;;  %v1226_v3 = vadd.f32 1.0, %v3006_v63 }
 0x30e   : > { %v3010_v11 = vpop.eup %3009  ;;  %1345 = vst [vmem:[#allocation4 + $0xa8] sm:$0xff] %v1313_v35  ;;  %v1227_v32 = vadd.f32 1.0, %v3008_v2 }
 0x30f   : > { %v3012_v6 = vpop.eup %3011  ;;  %v1314_v7 = vmul.f32 %v3010_v11, %v3880_v52  ;;  %3025 = vrcp.f32 %v1226_v3 }
 0x310   : > { %v1315_v10 = vmul.f32 %v3012_v6, %v3874_v48  ;;  %3027 = vrcp.f32 %v1227_v32 }
 0x311   : > { %1346 = vst [vmem:[#allocation4 + $0xb0] sm:$0xff] %v1314_v7 }
 0x312   : > { %v3014_v43 = vpop.eup %3013  ;;  %1347 = vst [vmem:[#allocation4 + $0xb8] sm:$0xff] %v1315_v10 }
 0x313   : > { %v3016_v53 = vpop.eup %3015  ;;  %v1316_v12 = vmul.f32 %v3014_v43, %v3892_v62 }
 0x314   : > { %v3018_v38 = vpop.eup %3017  ;;  %v1317_v15 = vmul.f32 %v3016_v53, %v3886_v57 }
 0x315   : > { %1348 = vst [vmem:[#allocation4 + $0xc0] sm:$0xff] %v1316_v12  ;;  %v1318_v8 = vmul.f32 %v3018_v38, %v3904_v9 }
 0x316   : > { %v3020_v16 = vpop.eup %3019  ;;  %1349 = vst [vmem:[#allocation4 + $0xc8] sm:$0xff] %v1317_v15 }
 0x317   : > { %1350 = vst [vmem:[#allocation4 + $0xd0] sm:$0xff] %v1318_v8  ;;  %v1319_v52 = vmul.f32 %v3020_v16, %v3898_v4 }
 0x318   : > { %v3022_v19 = vpop.eup %3021 }
 0x319   : > { %1351 = vst [vmem:[#allocation4 + $0xd8] sm:$0xff] %v1319_v52  ;;  %v1320_v48 = vmul.f32 %v3022_v19, %v3916_v18 }
 0x31a   : > { %v3024_v21 = vpop.eup %3023 }
 0x31b   : > { %1352 = vst [vmem:[#allocation4 + $0xe0] sm:$0xff] %v1320_v48  ;;  %v1321_v24 = vmul.f32 %v3024_v21, %v3910_v13 }
 0x31c   : > { %v3026_v62 = vpop.eup %3025 }
 0x31d   : > { %v3028_v61 = vpop.eup %3027  ;;  %1353 = vst [vmem:[#allocation4 + $0xe8] sm:$0xff] %v1321_v24  ;;  %v1322_v57 = vmul.f32 %v3026_v62, %v3928_v27 }
 0x31e   : > { %v1323_v9 = vmul.f32 %v3028_v61, %v3922_v22 }
 0x31f   : > { %1354 = vst [vmem:[#allocation4 + $0xf0] sm:$0xff] %v1322_v57 }
 0x320   : > { %1355 = vst [vmem:[#allocation4 + $0xf8] sm:$0xff] %v1323_v9 }
 0x321 PF: > { %s4564_s23 = sld [smem:[#allocation21_spill]]  ;;  %p2341_p9 = scmp.ne.s32.totalorder %s3387_s13, 0 }
 0x327   : > { %p1388_p8 = scmp.lt.s32.totalorder %s4564_s23, 0  ;;  %s1389_s8 = ssub.s32 0, %s4564_s23 }
 0x328   : > { %s2340_s26 = smin.u32 %s4564_s23, %s1389_s8  ;;  %1397 = sbr.rel (%p2341_p9) target bundleno = 822 (0x336), region = 76 }
 0x329   : > { %s1391_s3 = sand.u32 1, %s2340_s26  }
 0x32a   : > { %s1392_s6 = ssub.s32 0, %s1391_s3 }
 0x32b   : > { %s4599_s6 = smov (!%p1388_p8, %s1392_s6), %s1391_s3 }
 0x32c   : > { %s1394_s20 = ssub.s32 1, %s4599_s6 }
 0x32d   : > { %v3420_v4 = vmov 0.0  }
 0x32e   : > { %1398 = vst [vmem:[#allocation3 + $0x30] sm:$0xff] %v3420_v4  ;;  %1399 = vst [vmem:[#allocation3] sm:$0xff] %v3420_v4 }
 0x32f   : > { %1400 = vst [vmem:[#allocation3 + $0x58] sm:$0xff] %v3420_v4  ;;  %1401 = vst [vmem:[#allocation3 + $0x18] sm:$0xff] %v3420_v4 }
 0x330   : > { %1402 = vst [vmem:[#allocation3 + $0x50] sm:$0xff] %v3420_v4  ;;  %1403 = vst [vmem:[#allocation3 + $0x68] sm:$0xff] %v3420_v4 }
 0x331   : > { %1404 = vst [vmem:[#allocation3 + $0x8] sm:$0xff] %v3420_v4  ;;  %1405 = vst [vmem:[#allocation3 + $0x48] sm:$0xff] %v3420_v4 }
 0x332   : > { %1406 = vst [vmem:[#allocation3 + $0x40] sm:$0xff] %v3420_v4  ;;  %1407 = vst [vmem:[#allocation3 + $0x20] sm:$0xff] %v3420_v4 }
 0x333   : > { %1408 = vst [vmem:[#allocation3 + $0x10] sm:$0xff] %v3420_v4  ;;  %1409 = vst [vmem:[#allocation3 + $0x38] sm:$0xff] %v3420_v4 }
 0x334   : > { %1410 = vst [vmem:[#allocation3 + $0x60] sm:$0xff] %v3420_v4  ;;  %1411 = vst [vmem:[#allocation3 + $0x70] sm:$0xff] %v3420_v4 }
 0x335   : > { %1412 = vst [vmem:[#allocation3 + $0x78] sm:$0xff] %v3420_v4  ;;  %1413 = vst [vmem:[#allocation3 + $0x28] sm:$0xff] %v3420_v4 }
 0x336 PF: > { %s2342_s5 = sshll.u32 %s4599_s6, 8  ;;  %s2343_s10 = sshll.u32 %s3387_s13, 7  ;;  %v1450_v13 = vld [vmem:[%s3671_s22] sm:$0xff]  ;;  %v1451_v23 = vld [vmem:[%s3671_s22 + $0x8] sm:$0xff]  ;;  %v1452_v20 = vld [vmem:[%s3671_s22 + $0x10] sm:$0xff] }
 0x337   : > { %v1458_v18 = vld [vmem:[%s3671_s22 + $0x40] sm:$0xff]  ;;  %s1416_s28 = sadd.s32 %s2343_s10, %s2342_s5  ;;  %2690 = vmatprep.mubr.f32.mxu0 %v1450_v13  ;;  %v1459_v39 = vld [vmem:[%s3671_s22 + $0x48] sm:$0xff]  ;;  %v1460_v42 = vld [vmem:[%s3671_s22 + $0x50] sm:$0xff]  ;;  %p2344_p5 = scmp.ne.s32.totalorder %s3387_s13, 1 }
 0x338   : > { %2702 = vmatprep.mubr.f32.mxu1 %v1458_v18  ;;  %s4015_s0 = scalar_lea.vmem [#allocation2], %s1416_s28  ;;  %v1453_v5 = vld [vmem:[%s3671_s22 + $0x18] sm:$0xff]  ;;  %v1454_v46 = vld [vmem:[%s3671_s22 + $0x20] sm:$0xff]  ;;  %v1455_v49 = vld [vmem:[%s3671_s22 + $0x28] sm:$0xff]  ;;  %s2362_s29 = sshll.u32 (!%p2344_p5), %s1394_s20, 8 }
 0x339   : > { %v1433_v22 = vld [vmem:[%s4015_s0 + $0x78] sm:$0xff]  ;;  %v1432_v27 = vld [vmem:[%s4015_s0 + $0x70] sm:$0xff]  ;;  %v1431_v25 = vld [vmem:[%s4015_s0 + $0x68] sm:$0xff] }
 0x33a   : > { %2658 = vmatprep.subr.mxu0 %v1433_v22  ;;  %2714 = vmatprep.subr.mxu1 %v1433_v22  ;;  %v1430_v17 = vld [vmem:[%s4015_s0 + $0x60] sm:$0xff]  ;;  %v1429_v47 = vld [vmem:[%s4015_s0 + $0x58] sm:$0xff]  ;;  %v1428_v28 = vld [vmem:[%s4015_s0 + $0x50] sm:$0xff] }
 0x33b   : > { %2659 = vmatpush3.msra.mxu0 %v1433_v22  ;;  %2730 = vmatpush3.msra.mxu1 %v1433_v22  ;;  %v1427_v30 = vld [vmem:[%s4015_s0 + $0x48] sm:$0xff]  ;;  %v1426_v31 = vld [vmem:[%s4015_s0 + $0x40] sm:$0xff]  ;;  %v1425_v44 = vld [vmem:[%s4015_s0 + $0x38] sm:$0xff] }
 0x33c   : > { %2660 = vmatprep.subr.mxu0 %v1432_v27  ;;  %2715 = vmatprep.subr.mxu1 %v1432_v27  ;;  %v1424_v34 = vld [vmem:[%s4015_s0 + $0x30] sm:$0xff]  ;;  %v1423_v14 = vld [vmem:[%s4015_s0 + $0x28] sm:$0xff]  ;;  %v1422_v40 = vld [vmem:[%s4015_s0 + $0x20] sm:$0xff] }
 0x33d   : > { %2661 = vmatpush3.msra.mxu0 %v1432_v27  ;;  %2731 = vmatpush3.msra.mxu1 %v1432_v27  ;;  %v1421_v36 = vld [vmem:[%s4015_s0 + $0x18] sm:$0xff]  ;;  %v1420_v58 = vld [vmem:[%s4015_s0 + $0x10] sm:$0xff]  ;;  %v1419_v33 = vld [vmem:[%s4015_s0 + $0x8] sm:$0xff] }
 0x33e   : > { %2662 = vmatprep.subr.mxu0 %v1431_v25  ;;  %2716 = vmatprep.subr.mxu1 %v1431_v25  ;;  %v1418_v37 = vld [vmem:[%s4015_s0] sm:$0xff]  ;;  %v1461_v45 = vld [vmem:[%s3671_s22 + $0x58] sm:$0xff]  ;;  %v1463_v51 = vld [vmem:[%s3671_s22 + $0x68] sm:$0xff] }
 0x33f   : > { %2663 = vmatpush3.msra.mxu0 %v1431_v25  ;;  %2732 = vmatpush3.msra.mxu1 %v1431_v25  ;;  %v1462_v50 = vld [vmem:[%s3671_s22 + $0x60] sm:$0xff]  ;;  %v1456_v29 = vld [vmem:[%s3671_s22 + $0x30] sm:$0xff]  ;;  %v1457_v26 = vld [vmem:[%s3671_s22 + $0x38] sm:$0xff] }
 0x340   : > { %2664 = vmatprep.subr.mxu0 %v1430_v17  ;;  %2717 = vmatprep.subr.mxu1 %v1430_v17  ;;  %v1464_v41 = vld [vmem:[%s3671_s22 + $0x70] sm:$0xff]  ;;  %v1465_v54 = vld [vmem:[%s3671_s22 + $0x78] sm:$0xff]  ;;  %v1435_v56 = vld [vmem:[#allocation3] sm:$0xff]  ;;  %s2361_s22 = sshll.u32 (!%p2344_p5), %s3391_s7, 7 }
 0x341   : > { %2665 = vmatpush3.msra.mxu0 %v1430_v17  ;;  %2733 = vmatpush3.msra.mxu1 %v1430_v17  ;;  %v1443_v59 = vld [vmem:[#allocation3 + $0x20] sm:$0xff]  ;;  %v1434_v55 = vld [vmem:[#allocation3 + $0x30] sm:$0xff]  ;;  %v1437_v32 = vld [vmem:[#allocation3 + $0x18] sm:$0xff]  ;;  %s1897_s4 = sadd.s32 (!%p2344_p5), %s2362_s29, %s2361_s22 }
 0x342   : > { %2666 = vmatprep.subr.mxu0 %v1429_v47  ;;  %2718 = vmatprep.subr.mxu1 %v1429_v47  ;;  %v1442_v63 = vld [vmem:[#allocation3 + $0x40] sm:$0xff]  ;;  %v1445_v6 = vld [vmem:[#allocation3 + $0x38] sm:$0xff]  ;;  %v1444_v38 = vld [vmem:[#allocation3 + $0x10] sm:$0xff]  ;;  %s1898_s13 = scalar_lea.vmem (!%p2344_p5), [#allocation2], %s1897_s4 }
 0x343   : > { %2667 = vmatpush3.msra.mxu0 %v1429_v47  ;;  %2734 = vmatpush3.msra.mxu1 %v1429_v47  ;;  %v1436_v12 = vld [vmem:[#allocation3 + $0x58] sm:$0xff]  ;;  %v1439_v19 = vld [vmem:[#allocation3 + $0x68] sm:$0xff]  ;;  %v1447_v48 = vld [vmem:[#allocation3 + $0x70] sm:$0xff] }
 0x344   : > { %2668 = vmatprep.subr.mxu0 %v1428_v28  ;;  %2719 = vmatprep.subr.mxu1 %v1428_v28  ;;  %v1438_v57 = vld [vmem:[#allocation3 + $0x50] sm:$0xff]  ;;  %v1446_v9 = vld [vmem:[#allocation3 + $0x60] sm:$0xff]  ;;  %v1441_v27 = vld [vmem:[#allocation3 + $0x48] sm:$0xff] }
 0x345   : > { %2669 = vmatpush3.msra.mxu0 %v1428_v28  ;;  %2735 = vmatpush3.msra.mxu1 %v1428_v28  ;;  %v1449_v25 = vld [vmem:[#allocation3 + $0x28] sm:$0xff] }
 0x346   : > { %2670 = vmatprep.subr.mxu0 %v1427_v30  ;;  %2720 = vmatprep.subr.mxu1 %v1427_v30 }
 0x347   : > { %2671 = vmatpush3.msra.mxu0 %v1427_v30  ;;  %2736 = vmatpush3.msra.mxu1 %v1427_v30 }
 0x348   : > { %2672 = vmatprep.subr.mxu0 %v1426_v31  ;;  %2721 = vmatprep.subr.mxu1 %v1426_v31 }
 0x349   : > { %2673 = vmatpush3.msra.mxu0 %v1426_v31  ;;  %2737 = vmatpush3.msra.mxu1 %v1426_v31  ;;  %v1440_v31 = vld [vmem:[#allocation3 + $0x8] sm:$0xff] }
 0x34a   : > { %2674 = vmatprep.subr.mxu0 %v1425_v44  ;;  %2722 = vmatprep.subr.mxu1 %v1425_v44 }
 0x34b   : > { %2675 = vmatpush3.msra.mxu0 %v1425_v44  ;;  %2738 = vmatpush3.msra.mxu1 %v1425_v44  ;;  %v1448_v44 = vld [vmem:[#allocation3 + $0x78] sm:$0xff] }
 0x34c   : > { %2676 = vmatprep.subr.mxu0 %v1424_v34  ;;  %2723 = vmatprep.subr.mxu1 %v1424_v34 }
 0x34d   : > { %2677 = vmatpush3.msra.mxu0 %v1424_v34  ;;  %2739 = vmatpush3.msra.mxu1 %v1424_v34 }
 0x34e   : > { %2678 = vmatprep.subr.mxu0 %v1423_v14  ;;  %2724 = vmatprep.subr.mxu1 %v1423_v14 }
 0x34f   : > { %2679 = vmatpush3.msra.mxu0 %v1423_v14  ;;  %2740 = vmatpush3.msra.mxu1 %v1423_v14 }
 0x350   : > { %2680 = vmatprep.subr.mxu0 %v1422_v40  ;;  %2725 = vmatprep.subr.mxu1 %v1422_v40 }
 0x351   : > { %2681 = vmatpush3.msra.mxu0 %v1422_v40  ;;  %2741 = vmatpush3.msra.mxu1 %v1422_v40 }
 0x352   : > { %2682 = vmatprep.subr.mxu0 %v1421_v36  ;;  %2726 = vmatprep.subr.mxu1 %v1421_v36 }
 0x353   : > { %2683 = vmatpush3.msra.mxu0 %v1421_v36  ;;  %2742 = vmatpush3.msra.mxu1 %v1421_v36 }
 0x354   : > { %2684 = vmatprep.subr.mxu0 %v1420_v58  ;;  %2727 = vmatprep.subr.mxu1 %v1420_v58 }
 0x355   : > { %2685 = vmatpush3.msra.mxu0 %v1420_v58  ;;  %2743 = vmatpush3.msra.mxu1 %v1420_v58 }
 0x356   : > { %2686 = vmatprep.subr.mxu0 %v1419_v33  ;;  %2728 = vmatprep.subr.mxu1 %v1419_v33 }
 0x357   : > { %2687 = vmatpush3.msra.mxu0 %v1419_v33  ;;  %2744 = vmatpush3.msra.mxu1 %v1419_v33 }
 0x358   : > { %2688 = vmatprep.subr.mxu0 %v1418_v37  ;;  %2729 = vmatprep.subr.mxu1 %v1418_v37 }
 0x359   : > { %2689 = vmatpush3.msra.mxu0 %v1418_v37  ;;  %2745 = vmatpush3.msra.mxu1 %v1418_v37 }
 0x35a   : > { %2691 = vmatmul.mubr.f32.vlgmr.msra.gmra.mxu0 %v1451_v23  ;;  %2703 = vmatmul.mubr.f32.vlgmr.msra.gmra.mxu1 %v1459_v39 }
 0x35b   : > { %2693 = vmatprep.mubr.f32.mxu0 %v1452_v20  ;;  %2705 = vmatprep.mubr.f32.mxu1 %v1460_v42 }
 0x35e   : > { %2694 = vmatmul.mubr.f32.gmra.mxu0 %v1453_v5  ;;  %2706 = vmatmul.mubr.f32.gmra.mxu1 %v1461_v45 }
 0x35f   : > { %2696 = vmatprep.mubr.f32.mxu0 %v1454_v46  ;;  %2708 = vmatprep.mubr.f32.mxu1 %v1462_v50 }
 0x362   : > { %2697 = vmatmul.mubr.f32.gmra.mxu0 %v1455_v49  ;;  %2709 = vmatmul.mubr.f32.gmra.mxu1 %v1463_v51 }
 0x363   : > { %2699 = vmatprep.mubr.f32.mxu0 %v1456_v29  ;;  %2711 = vmatprep.mubr.f32.mxu1 %v1464_v41 }
 0x366   : > { %2700 = vmatmul.mubr.f32.gmra.mxu0 %v1457_v26  ;;  %2712 = vmatmul.mubr.f32.gmra.mxu1 %v1465_v54 }
 0x41a   : > { %v2692_v60 = vpop.f32.mrf.mxu0  ;;  %v2704_v1 = vpop.f32.mrf.mxu1 }
 0x41b   : > { %v1612_v35 = vadd.f32 %v2692_v60, %v1435_v56  ;;  %v1620_v2 = vadd.f32 %v2704_v1, %v1443_v59 }
 0x41c   : > { %v1532_v3 = vpop.f32.mrf.mxu0  ;;  %v1572_v11 = vpop.f32.mrf.mxu1 }
 0x41d   : > { %1628 = vst [vmem:[#allocation3] sm:$0xff] %v1612_v35  ;;  %1636 = vst [vmem:[#allocation3 + $0x20] sm:$0xff] %v1620_v2  ;;  %v1611_v7 = vadd.f32 %v1532_v3, %v1434_v55  ;;  %v1619_v10 = vadd.f32 %v1572_v11, %v1442_v63 }
 0x41e   : > { %v2695_v43 = vpop.f32.mrf.mxu0  ;;  %v2707_v53 = vpop.f32.mrf.mxu1 }
 0x41f   : > { %1627 = vst [vmem:[#allocation3 + $0x30] sm:$0xff] %v1611_v7  ;;  %1635 = vst [vmem:[#allocation3 + $0x40] sm:$0xff] %v1619_v10  ;;  %v1614_v15 = vadd.f32 %v2695_v43, %v1437_v32  ;;  %v1622_v8 = vadd.f32 %v2707_v53, %v1445_v6 }
 0x420   : > { %v1542_v16 = vpop.f32.mrf.mxu0  ;;  %v1582_v52 = vpop.f32.mrf.mxu1 }
 0x421   : > { %1630 = vst [vmem:[#allocation3 + $0x18] sm:$0xff] %v1614_v15  ;;  %1638 = vst [vmem:[#allocation3 + $0x38] sm:$0xff] %v1622_v8  ;;  %v1613_v21 = vadd.f32 %v1542_v16, %v1436_v12  ;;  %v1621_v24 = vadd.f32 %v1582_v52, %v1444_v38 }
 0x422   : > { %v2698_v62 = vpop.f32.mrf.mxu0  ;;  %v2710_v61 = vpop.f32.mrf.mxu1 }
 0x423   : > { %1629 = vst [vmem:[#allocation3 + $0x58] sm:$0xff] %v1613_v21  ;;  %1637 = vst [vmem:[#allocation3 + $0x10] sm:$0xff] %v1621_v24  ;;  %v1616_v4 = vadd.f32 %v2698_v62, %v1439_v19  ;;  %v1624_v13 = vadd.f32 %v2710_v61, %v1447_v48 }
 0x424   : > { %v1552_v18 = vpop.f32.mrf.mxu0  ;;  %v1592_v22 = vpop.f32.mrf.mxu1 }
 0x425   : > { %1632 = vst [vmem:[#allocation3 + $0x68] sm:$0xff] %v1616_v4  ;;  %1640 = vst [vmem:[#allocation3 + $0x70] sm:$0xff] %v1624_v13  ;;  %v1615_v17 = vadd.f32 %v1552_v18, %v1438_v57  ;;  %v1623_v47 = vadd.f32 %v1592_v22, %v1446_v9 }
 0x426   : > { %v2701_v28 = vpop.f32.mrf.mxu0  ;;  %v2713_v30 = vpop.f32.mrf.mxu1 }
 0x427   : > { %1631 = vst [vmem:[#allocation3 + $0x50] sm:$0xff] %v1615_v17  ;;  %1639 = vst [vmem:[#allocation3 + $0x60] sm:$0xff] %v1623_v47  ;;  %v1618_v34 = vadd.f32 %v2701_v28, %v1441_v27  ;;  %v1626_v14 = vadd.f32 %v2713_v30, %v1449_v25  ;;  %1646 = sbr.rel (%p2344_p5) target bundleno = 1603 (0x643), region = 80 }
 0x428   : > { %v1562_v40 = vpop.f32.mrf.mxu0  ;;  %v1602_v36 = vpop.f32.mrf.mxu1 }
 0x429   : > { %1634 = vst [vmem:[#allocation3 + $0x48] sm:$0xff] %v1618_v34  ;;  %1642 = vst [vmem:[#allocation3 + $0x28] sm:$0xff] %v1626_v14  ;;  %v1617_v58 = vadd.f32 %v1562_v40, %v1440_v31  ;;  %v1625_v33 = vadd.f32 %v1602_v36, %v1448_v44 }
 0x42b   : > { %1633 = vst [vmem:[#allocation3 + $0x8] sm:$0xff] %v1617_v58  ;;  %1641 = vst [vmem:[#allocation3 + $0x78] sm:$0xff] %v1625_v33 }
 0x42c   : > { %v4048_v37 = vld [vmem:[#allocation3 + $0x30] sm:$0xff]  ;;  %v1664_v23 = vlaneseq  ;;  %v4053_v39 = vld [vmem:[#allocation3 + $0x58] sm:$0xff]  ;;  %v4055_v20 = vld [vmem:[#allocation3] sm:$0xff]  ;;  %v4120_v16 = vstv %s3686_s24  ;;  %s4143_s24 = scalar_lea.vmem [#allocation4], %s2361_s22 }
 0x42d   : > { %v4059_v42 = vld [vmem:[#allocation3 + $0x18] sm:$0xff]  ;;  %v4063_v45 = vld [vmem:[#allocation3 + $0x68] sm:$0xff]  ;;  %v4070_v51 = vld [vmem:[#allocation3 + $0x40] sm:$0xff]  ;;  %1899 = vst [vmem:[%s1898_s13] sm:$0xff] %v4048_v37 }
 0x42e   : > { %v4061_v5 = vld [vmem:[#allocation3 + $0x50] sm:$0xff]  ;;  %v1665_v46 = vshrl.u32 %v1664_v23, 7  ;;  %1901 = vst [vmem:[%s1898_s13 + $0x10] sm:$0xff] %v4053_v39  ;;  %1900 = vst [vmem:[%s1898_s13 + $0x8] sm:$0xff] %v4055_v20  ;;  %v4081_v29 = vld [vmem:[#allocation3 + $0x20] sm:$0xff] }
 0x42f   : > { %1902 = vst [vmem:[%s1898_s13 + $0x18] sm:$0xff] %v4059_v42  ;;  %1903 = vst [vmem:[%s1898_s13 + $0x20] sm:$0xff] %v4061_v5  ;;  %v4083_v41 = vld [vmem:[#allocation3 + $0x10] sm:$0xff]  ;;  %v4085_v26 = vld [vmem:[#allocation3 + $0x38] sm:$0xff] }
 0x430   : > { %v4068_v49 = vld [vmem:[#allocation3 + $0x48] sm:$0xff]  ;;  %1904 = vst [vmem:[%s1898_s13 + $0x28] sm:$0xff] %v4063_v45  ;;  %1907 = vst [vmem:[%s1898_s13 + $0x40] sm:$0xff] %v4070_v51  ;;  %v1666_v54 = vsub.s32 0, %v1665_v46  ;;  %v4090_v56 = vld [vmem:[#allocation3 + $0x60] sm:$0xff] }
 0x431   : > { %1906 = vst [vmem:[%s1898_s13 + $0x38] sm:$0xff] %v4068_v49  ;;  %1908 = vst [vmem:[%s1898_s13 + $0x48] sm:$0xff] %v4081_v29  ;;  %v4092_v59 = vld [vmem:[#allocation3 + $0x70] sm:$0xff]  ;;  %v4099_v1 = vld [vmem:[#allocation3 + $0x28] sm:$0xff] }
 0x432   : > { %v4066_v50 = vld [vmem:[#allocation3 + $0x8] sm:$0xff]  ;;  %1909 = vst [vmem:[%s1898_s13 + $0x50] sm:$0xff] %v4083_v41  ;;  %1910 = vst [vmem:[%s1898_s13 + $0x58] sm:$0xff] %v4085_v26  ;;  %v4094_v60 = vld [vmem:[#allocation3 + $0x78] sm:$0xff]  ;;  %v1667_v55 = vrot.slane %v3696_v0, %v1666_v54 }
 0x433   : > { %1905 = vst [vmem:[%s1898_s13 + $0x30] sm:$0xff] %v4066_v50  ;;  %1911 = vst [vmem:[%s1898_s13 + $0x60] sm:$0xff] %v4090_v56 }
 0x434   : > { %1912 = vst [vmem:[%s1898_s13 + $0x68] sm:$0xff] %v4092_v59  ;;  %1913 = vst [vmem:[%s1898_s13 + $0x70] sm:$0xff] %v4094_v60  ;;  %v1669_v63 = vmul.f32 %v1667_v55, %v4048_v37  ;;  %v1671_v35 = vmul.f32 %v1667_v55, %v4053_v39  ;;  %v1670_v2 = vmul.f32 %v1667_v55, %v4055_v20 }
 0x435   : > { %1914 = vst [vmem:[%s1898_s13 + $0x78] sm:$0xff] %v4099_v1  ;;  %v1672_v3 = vmul.f32 %v1667_v55, %v4059_v42  ;;  %v1673_v11 = vmul.f32 %v1667_v55, %v4061_v5  ;;  %v1674_v32 = vmul.f32 %v1667_v55, %v4063_v45  ;;  %v1675_v0 = vmul.f32 %v1667_v55, %v4066_v50 }
 0x436   : > { %1685 = vadd.xlane.f32.xlu0 %v1669_v63  ;;  %1689 = vadd.xlane.f32.xlu1 %v1671_v35  ;;  %v1676_v6 = vmul.f32 %v1667_v55, %v4068_v49  ;;  %v1677_v7 = vmul.f32 %v1667_v55, %v4070_v51  ;;  %v1678_v10 = vmul.f32 %v1667_v55, %v4081_v29 }
 0x437   : > { %v1679_v43 = vmul.f32 %v1667_v55, %v4083_v41  ;;  %v1680_v53 = vmul.f32 %v1667_v55, %v4085_v26  ;;  %v1681_v12 = vmul.f32 %v1667_v55, %v4090_v56  ;;  %v1682_v38 = vmul.f32 %v1667_v55, %v4092_v59 }
 0x438   : > { %v1683_v15 = vmul.f32 %v1667_v55, %v4094_v60  ;;  %v1684_v8 = vmul.f32 %v1667_v55, %v4099_v1 }
 0x43a   : > { %1687 = vadd.xlane.f32.xlu0 %v1670_v2  ;;  %1691 = vadd.xlane.f32.xlu1 %v1672_v3 }
 0x43e   : > { %1693 = vadd.xlane.f32.xlu0 %v1673_v11  ;;  %1695 = vadd.xlane.f32.xlu1 %v1674_v32 }
 0x442   : > { %1697 = vadd.xlane.f32.xlu0 %v1675_v0  ;;  %1699 = vadd.xlane.f32.xlu1 %v1676_v6 }
 0x446   : > { %1701 = vadd.xlane.f32.xlu0 %v1677_v7  ;;  %1703 = vadd.xlane.f32.xlu1 %v1678_v10 }
 0x44a   : > { %1705 = vadd.xlane.f32.xlu0 %v1679_v43  ;;  %1707 = vadd.xlane.f32.xlu1 %v1680_v53 }
 0x44e   : > { %1709 = vadd.xlane.f32.xlu0 %v1681_v12  ;;  %1711 = vadd.xlane.f32.xlu1 %v1682_v38 }
 0x452   : > { %1713 = vadd.xlane.f32.xlu0 %v1683_v15  ;;  %1715 = vadd.xlane.f32.xlu1 %v1684_v8 }
 0x4bf   : > { %v1686_v52 = vpop.xlane.xlu0 %1685  ;;  %v1690_v19 = vpop.xlane.xlu1 %1689 }
 0x4c0   : > { %v1718_v48 = vadd.f32 %v4120_v16, %v1686_v52  ;;  %v1720_v21 = vadd.f32 %v4120_v16, %v1690_v19 }
 0x4c2   : > { %v2345_v24 = vmul.f32 -1.442695, %v1718_v48  ;;  %v2347_v62 = vmul.f32 -1.442695, %v1720_v21 }
 0x4c3   : > { %v1688_v61 = vpop.xlane.xlu0 %1687  ;;  %v1692_v57 = vpop.xlane.xlu1 %1691 }
 0x4c4   : > { %3029 = vpow2.f32 %v2345_v24  ;;  %v1719_v9 = vadd.f32 %v4120_v16, %v1688_v61  ;;  %v1721_v4 = vadd.f32 %v4120_v16, %v1692_v57 }
 0x4c5   : > { %3031 = vpow2.f32 %v2347_v62 }
 0x4c6   : > { %v2346_v13 = vmul.f32 -1.442695, %v1719_v9  ;;  %v2348_v18 = vmul.f32 -1.442695, %v1721_v4 }
 0x4c7   : > { %v1694_v22 = vpop.xlane.xlu0 %1693  ;;  %v1696_v27 = vpop.xlane.xlu1 %1695 }
 0x4c8   : > { %3033 = vpow2.f32 %v2346_v13  ;;  %v1722_v25 = vadd.f32 %v4120_v16, %v1694_v22  ;;  %v1723_v17 = vadd.f32 %v4120_v16, %v1696_v27 }
 0x4c9   : > { %3035 = vpow2.f32 %v2348_v18 }
 0x4ca   : > { %v2349_v47 = vmul.f32 -1.442695, %v1722_v25  ;;  %v2350_v28 = vmul.f32 -1.442695, %v1723_v17 }
 0x4cb   : > { %v1698_v30 = vpop.xlane.xlu0 %1697  ;;  %v1700_v31 = vpop.xlane.xlu1 %1699 }
 0x4cc   : > { %3037 = vpow2.f32 %v2349_v47  ;;  %v1724_v44 = vadd.f32 %v4120_v16, %v1698_v30  ;;  %v1725_v34 = vadd.f32 %v4120_v16, %v1700_v31  ;;  %v4139_v47 = vand.u32 127, %v1664_v23  ;;  %v1834_v23 = vld [vmem:[%s4143_s24 + $0x10] sm:$0xff] }
 0x4cd   : > { %3039 = vpow2.f32 %v2350_v28 }
 0x4ce   : > { %v2351_v14 = vmul.f32 -1.442695, %v1724_v44  ;;  %v2352_v40 = vmul.f32 -1.442695, %v1725_v34  ;;  %vm1917_vm0 = vcmp.lt.s32.totalorder %v4139_v47, 8 }
 0x4cf   : > { %v1702_v36 = vpop.xlane.xlu0 %1701  ;;  %v1704_v58 = vpop.xlane.xlu1 %1703 }
 0x4d0   : > { %3041 = vpow2.f32 %v2351_v14  ;;  %v1726_v33 = vadd.f32 %v4120_v16, %v1702_v36  ;;  %v1727_v46 = vadd.f32 %v4120_v16, %v1704_v58 }
 0x4d1   : > { %v3030_v54 = vpop.eup %3029  ;;  %3043 = vpow2.f32 %v2352_v40 }
 0x4d2   : > { %v3032_v55 = vpop.eup %3031  ;;  %v1782_v63 = vadd.f32 1.0, %v3030_v54  ;;  %v2353_v35 = vmul.f32 -1.442695, %v1726_v33  ;;  %v2354_v3 = vmul.f32 -1.442695, %v1727_v46 }
 0x4d3   : > { %v1784_v2 = vadd.f32 1.0, %v3032_v55  ;;  %v1706_v11 = vpop.xlane.xlu0 %1705  ;;  %v1708_v32 = vpop.xlane.xlu1 %1707 }
 0x4d4   : > { %3045 = vrcp.f32 %v1782_v63  ;;  %v1728_v0 = vadd.f32 %v4120_v16, %v1706_v11  ;;  %v1729_v6 = vadd.f32 %v4120_v16, %v1708_v32  ;;  %v1833_v63 = vld [vmem:[%s4143_s24 + $0x8] sm:$0xff] }
 0x4d5   : > { %v3034_v7 = vpop.eup %3033  ;;  %3047 = vrcp.f32 %v1784_v2 }
 0x4d6   : > { %v3036_v10 = vpop.eup %3035  ;;  %v1783_v43 = vadd.f32 1.0, %v3034_v7  ;;  %3049 = vpow2.f32 %v2353_v35  ;;  %v2355_v53 = vmul.f32 -1.442695, %v1728_v0  ;;  %v2356_v38 = vmul.f32 -1.442695, %v1729_v6 }
 0x4d7   : > { %v1785_v12 = vadd.f32 1.0, %v3036_v10  ;;  %3051 = vpow2.f32 %v2354_v3  ;;  %v1710_v15 = vpop.xlane.xlu0 %1709  ;;  %v1712_v8 = vpop.xlane.xlu1 %1711  ;;  %v1835_v3 = vld [vmem:[%s4143_s24 + $0x18] sm:$0xff] }
 0x4d8   : > { %3053 = vrcp.f32 %v1783_v43  ;;  %v1730_v52 = vadd.f32 %v4120_v16, %v1710_v15  ;;  %v1731_v19 = vadd.f32 %v4120_v16, %v1712_v8  ;;  %v1837_v15 = vld [vmem:[%s4143_s24 + $0x28] sm:$0xff] }
 0x4d9   : > { %v3038_v48 = vpop.eup %3037  ;;  %3055 = vrcp.f32 %v1785_v12 }
 0x4da   : > { %v3040_v21 = vpop.eup %3039  ;;  %v1786_v24 = vadd.f32 1.0, %v3038_v48  ;;  %3057 = vpow2.f32 %v2355_v53  ;;  %v2357_v62 = vmul.f32 -1.442695, %v1730_v52  ;;  %v2358_v57 = vmul.f32 -1.442695, %v1731_v19  ;;  %v1836_v53 = vld [vmem:[%s4143_s24 + $0x20] sm:$0xff] }
 0x4db   : > { %v1787_v61 = vadd.f32 1.0, %v3040_v21  ;;  %3059 = vpow2.f32 %v2356_v38  ;;  %v1714_v9 = vpop.xlane.xlu0 %1713  ;;  %v1716_v4 = vpop.xlane.xlu1 %1715 }
 0x4dc   : > { %3061 = vrcp.f32 %v1786_v24  ;;  %v1732_v13 = vadd.f32 %v4120_v16, %v1714_v9  ;;  %v1733_v18 = vadd.f32 %v4120_v16, %v1716_v4  ;;  %v1832_v16 = vld [vmem:[%s4143_s24] sm:$0xff] }
 0x4dd   : > { %v3042_v22 = vpop.eup %3041  ;;  %3063 = vrcp.f32 %v1787_v61 }
 0x4de   : > { %v3044_v27 = vpop.eup %3043  ;;  %v1788_v25 = vadd.f32 1.0, %v3042_v22  ;;  %3065 = vpow2.f32 %v2357_v62  ;;  %v2359_v17 = vmul.f32 -1.442695, %v1732_v13  ;;  %v2360_v30 = vmul.f32 -1.442695, %v1733_v18  ;;  %v1839_v13 = vld [vmem:[%s4143_s24 + $0x38] sm:$0xff] }
 0x4df   : > { %v1789_v28 = vadd.f32 1.0, %v3044_v27  ;;  %3067 = vpow2.f32 %v2358_v57  ;;  %v1838_v57 = vld [vmem:[%s4143_s24 + $0x30] sm:$0xff] }
 0x4e0   : > { %3069 = vrcp.f32 %v1788_v25 }
 0x4e1   : > { %v3046_v31 = vpop.eup %3045  ;;  %3071 = vrcp.f32 %v1789_v28 }
 0x4e2   : > { %v3048_v44 = vpop.eup %3047  ;;  %3073 = vpow2.f32 %v2359_v17  ;;  %v1848_v34 = vmul.f32 %v3046_v31, %v4048_v37 }
 0x4e3   : > { %v3050_v14 = vpop.eup %3049  ;;  %3075 = vpow2.f32 %v2360_v30  ;;  %v1850_v40 = vmul.f32 %v3048_v44, %v4053_v39 }
 0x4e4   : > { %v3052_v36 = vpop.eup %3051  ;;  %v1790_v58 = vadd.f32 1.0, %v3050_v14  ;;  %v1864_v33 = vadd.f32 %v1848_v34, %v1832_v16  ;;  %v1841_v14 = vld [vmem:[%s4143_s24 + $0x48] sm:$0xff] }
 0x4e5   : > { %v3054_v46 = vpop.eup %3053  ;;  %v1791_v54 = vadd.f32 1.0, %v3052_v36  ;;  %v1866_v55 = vadd.f32 %v1850_v40, %v1834_v23 }
 0x4e6   : > { %v3056_v35 = vpop.eup %3055  ;;  %3077 = vrcp.f32 %v1790_v58  ;;  %v4153_v37 = vsel %vm1917_vm0, %v1864_v33, -1e+30  ;;  %1880 = vst [vmem:[%s4143_s24] sm:$0xff] %v1864_v33  ;;  %v1849_v2 = vmul.f32 %v3054_v46, %v4055_v20  ;;  %v1842_v46 = vld [vmem:[%s4143_s24 + $0x50] sm:$0xff] }
 0x4e7   : > { %v3058_v39 = vpop.eup %3057  ;;  %3079 = vrcp.f32 %v1791_v54  ;;  %1934 = vmax.xlane.f32.xlu0 %v4153_v37  ;;  %1882 = vst [vmem:[%s4143_s24 + $0x10] sm:$0xff] %v1866_v55  ;;  %v1851_v11 = vmul.f32 %v3056_v35, %v4059_v42  ;;  %v4163_v6 = vsel %vm1917_vm0, %v1866_v55, -1e+30 }
 0x4e8   : > { %v3060_v32 = vpop.eup %3059  ;;  %v1792_v0 = vadd.f32 1.0, %v3058_v39  ;;  %v1865_v7 = vadd.f32 %v1849_v2, %v1833_v63  ;;  %v1843_v63 = vld [vmem:[%s4143_s24 + $0x58] sm:$0xff] }
 0x4e9   : > { %v3062_v10 = vpop.eup %3061  ;;  %v1793_v20 = vadd.f32 1.0, %v3060_v32  ;;  %v1867_v43 = vadd.f32 %v1851_v11, %v1835_v3  ;;  %v1844_v11 = vld [vmem:[%s4143_s24 + $0x60] sm:$0xff] }
 0x4ea   : > { %v3064_v12 = vpop.eup %3063  ;;  %3081 = vrcp.f32 %v1792_v0  ;;  %v4168_v38 = vsel %vm1917_vm0, %v1865_v7, -1e+30  ;;  %1881 = vst [vmem:[%s4143_s24 + $0x8] sm:$0xff] %v1865_v7  ;;  %v1852_v42 = vmul.f32 %v3062_v10, %v4061_v5  ;;  %v1845_v7 = vld [vmem:[%s4143_s24 + $0x68] sm:$0xff] }
 0x4eb   : > { %v3066_v8 = vpop.eup %3065  ;;  %3083 = vrcp.f32 %v1793_v20  ;;  %1938 = vmax.xlane.f32.xlu0 %v4163_v6  ;;  %1936 = vmax.xlane.f32.xlu1 %v4168_v38  ;;  %1883 = vst [vmem:[%s4143_s24 + $0x18] sm:$0xff] %v1867_v43  ;;  %v1853_v52 = vmul.f32 %v3064_v12, %v4063_v45  ;;  %v4179_v21 = vsel %vm1917_vm0, %v1867_v43, -1e+30  ;;  %v1846_v12 = vld [vmem:[%s4143_s24 + $0x70] sm:$0xff] }
 0x4ec   : > { %v3068_v19 = vpop.eup %3067  ;;  %v1794_v48 = vadd.f32 1.0, %v3066_v8  ;;  %v1868_v5 = vadd.f32 %v1852_v42, %v1836_v53  ;;  %v1847_v8 = vld [vmem:[%s4143_s24 + $0x78] sm:$0xff] }
 0x4ed   : > { %v3070_v24 = vpop.eup %3069  ;;  %v1795_v62 = vadd.f32 1.0, %v3068_v19  ;;  %v1869_v61 = vadd.f32 %v1853_v52, %v1837_v15 }
 0x4ee   : > { %v3072_v9 = vpop.eup %3071  ;;  %3085 = vrcp.f32 %v1794_v48  ;;  %v4184_v4 = vsel %vm1917_vm0, %v1868_v5, -1e+30  ;;  %1884 = vst [vmem:[%s4143_s24 + $0x20] sm:$0xff] %v1868_v5  ;;  %v1854_v45 = vmul.f32 %v3070_v24, %v4066_v50 }
 0x4ef   : > { %v3074_v18 = vpop.eup %3073  ;;  %3087 = vrcp.f32 %v1795_v62  ;;  %1940 = vmax.xlane.f32.xlu1 %v4179_v21  ;;  %1942 = vmax.xlane.f32.xlu0 %v4184_v4  ;;  %1885 = vst [vmem:[%s4143_s24 + $0x28] sm:$0xff] %v1869_v61  ;;  %v1855_v22 = vmul.f32 %v3072_v9, %v4068_v49  ;;  %v4195_v17 = vsel %vm1917_vm0, %v1869_v61, -1e+30  ;;  %v1840_v49 = vld [vmem:[%s4143_s24 + $0x40] sm:$0xff] }
 0x4f0   : > { %v3076_v27 = vpop.eup %3075  ;;  %v1796_v25 = vadd.f32 1.0, %v3074_v18  ;;  %v1870_v50 = vadd.f32 %v1854_v45, %v1838_v57 }
 0x4f1   : > { %v1797_v28 = vadd.f32 1.0, %v3076_v27  ;;  %v1871_v30 = vadd.f32 %v1855_v22, %v1839_v13 }
 0x4f2   : > { %3089 = vrcp.f32 %v1796_v25  ;;  %v4199_v31 = vsel %vm1917_vm0, %v1870_v50, -1e+30  ;;  %1886 = vst [vmem:[%s4143_s24 + $0x30] sm:$0xff] %v1870_v50 }
 0x4f3   : > { %v3078_v16 = vpop.eup %3077  ;;  %3091 = vrcp.f32 %v1797_v28  ;;  %1944 = vmax.xlane.f32.xlu1 %v4195_v17  ;;  %1946 = vmax.xlane.f32.xlu0 %v4199_v31  ;;  %1887 = vst [vmem:[%s4143_s24 + $0x38] sm:$0xff] %v1871_v30  ;;  %v4208_v34 = vsel %vm1917_vm0, %v1871_v30, -1e+30 }
 0x4f4   : > { %v3080_v44 = vpop.eup %3079  ;;  %v1856_v23 = vmul.f32 %v3078_v16, %v4070_v51 }
 0x4f5   : > { %v1857_v40 = vmul.f32 %v3080_v44, %v4081_v29 }
 0x4f6   : > { %v1872_v36 = vadd.f32 %v1856_v23, %v1840_v49 }
 0x4f7   : > { %v3082_v58 = vpop.eup %3081  ;;  %1948 = vmax.xlane.f32.xlu1 %v4208_v34  ;;  %v1873_v33 = vadd.f32 %v1857_v40, %v1841_v14 }
 0x4f8   : > { %v3084_v54 = vpop.eup %3083  ;;  %v4217_v55 = vsel %vm1917_vm0, %v1872_v36, -1e+30  ;;  %1888 = vst [vmem:[%s4143_s24 + $0x40] sm:$0xff] %v1872_v36  ;;  %v1858_v51 = vmul.f32 %v3082_v58, %v4083_v41 }
 0x4f9   : > { %1950 = vmax.xlane.f32.xlu0 %v4217_v55  ;;  %1889 = vst [vmem:[%s4143_s24 + $0x48] sm:$0xff] %v1873_v33  ;;  %v4226_v29 = vsel %vm1917_vm0, %v1873_v33, -1e+30  ;;  %v1859_v35 = vmul.f32 %v3084_v54, %v4085_v26 }
 0x4fa   : > { %v1874_v2 = vadd.f32 %v1858_v51, %v1842_v46 }
 0x4fb   : > { %v3086_v3 = vpop.eup %3085  ;;  %1952 = vmax.xlane.f32.xlu1 %v4226_v29  ;;  %v1875_v39 = vadd.f32 %v1859_v35, %v1843_v63 }
 0x4fc   : > { %v3088_v32 = vpop.eup %3087  ;;  %v4233_v41 = vsel %vm1917_vm0, %v1874_v2, -1e+30  ;;  %1890 = vst [vmem:[%s4143_s24 + $0x50] sm:$0xff] %v1874_v2  ;;  %v1860_v0 = vmul.f32 %v3086_v3, %v4090_v56 }
 0x4fd   : > { %1954 = vmax.xlane.f32.xlu0 %v4233_v41  ;;  %1891 = vst [vmem:[%s4143_s24 + $0x58] sm:$0xff] %v1875_v39  ;;  %v4242_v26 = vsel %vm1917_vm0, %v1875_v39, -1e+30  ;;  %v1861_v10 = vmul.f32 %v3088_v32, %v4092_v59 }
 0x4fe   : > { %v1876_v20 = vadd.f32 %v1860_v0, %v1844_v11 }
 0x4ff   : > { %v3090_v43 = vpop.eup %3089  ;;  %1956 = vmax.xlane.f32.xlu1 %v4242_v26  ;;  %v1877_v53 = vadd.f32 %v1861_v10, %v1845_v7 }
 0x500   : > { %v3092_v56 = vpop.eup %3091  ;;  %v4249_v42 = vsel %vm1917_vm0, %v1876_v20, -1e+30  ;;  %1892 = vst [vmem:[%s4143_s24 + $0x60] sm:$0xff] %v1876_v20  ;;  %v1862_v15 = vmul.f32 %v3090_v43, %v4094_v60 }
 0x501   : > { %1958 = vmax.xlane.f32.xlu0 %v4249_v42  ;;  %1893 = vst [vmem:[%s4143_s24 + $0x68] sm:$0xff] %v1877_v53  ;;  %v4258_v59 = vsel %vm1917_vm0, %v1877_v53, -1e+30  ;;  %v1863_v52 = vmul.f32 %v3092_v56, %v4099_v1 }
 0x502   : > { %v1878_v19 = vadd.f32 %v1862_v15, %v1846_v12 }
 0x503   : > { %1960 = vmax.xlane.f32.xlu1 %v4258_v59  ;;  %v1879_v48 = vadd.f32 %v1863_v52, %v1847_v8 }
 0x504   : > { %v4264_v5 = vsel %vm1917_vm0, %v1878_v19, -1e+30  ;;  %1894 = vst [vmem:[%s4143_s24 + $0x70] sm:$0xff] %v1878_v19 }
 0x505   : > { %1962 = vmax.xlane.f32.xlu0 %v4264_v5  ;;  %1895 = vst [vmem:[%s4143_s24 + $0x78] sm:$0xff] %v1879_v48  ;;  %v4271_v60 = vsel %vm1917_vm0, %v1879_v48, -1e+30 }
 0x507   : > { %1964 = vmax.xlane.f32.xlu1 %v4271_v60 }
 0x570   : > { %v4274_v24 = vpop.xlane.xlu0 %1934 }
 0x571   : > { %v1966_v1 = vsub.f32 %v4153_v37, %v4274_v24 }
 0x573   : > { %v1982_v62 = vmul.f32 1.442695, %v1966_v1 }
 0x574   : > { %v4278_v61 = vpop.xlane.xlu1 %1936  ;;  %v4280_v57 = vpop.xlane.xlu0 %1938 }
 0x575   : > { %3093 = vpow2.f32 %v1982_v62  ;;  %v1967_v9 = vsub.f32 %v4168_v38, %v4278_v61  ;;  %v1968_v45 = vsub.f32 %v4163_v6, %v4280_v57 }
 0x577   : > { %v1984_v13 = vmul.f32 1.442695, %v1967_v9  ;;  %v1986_v18 = vmul.f32 1.442695, %v1968_v45 }
 0x578   : > { %v4286_v22 = vpop.xlane.xlu1 %1940  ;;  %v4288_v27 = vpop.xlane.xlu0 %1942 }
 0x579   : > { %3095 = vpow2.f32 %v1984_v13  ;;  %v1969_v25 = vsub.f32 %v4179_v21, %v4286_v22  ;;  %v1970_v50 = vsub.f32 %v4184_v4, %v4288_v27 }
 0x57a   : > { %3097 = vpow2.f32 %v1986_v18 }
 0x57b   : > { %v1988_v28 = vmul.f32 1.442695, %v1969_v25  ;;  %v1990_v30 = vmul.f32 1.442695, %v1970_v50 }
 0x57c   : > { %v4294_v16 = vpop.xlane.xlu1 %1944  ;;  %v4296_v49 = vpop.xlane.xlu0 %1946 }
 0x57d   : > { %3099 = vpow2.f32 %v1988_v28  ;;  %v1971_v44 = vsub.f32 %v4195_v17, %v4294_v16  ;;  %v1972_v23 = vsub.f32 %v4199_v31, %v4296_v49 }
 0x57e   : > { %3101 = vpow2.f32 %v1990_v30 }
 0x57f   : > { %v1992_v14 = vmul.f32 1.442695, %v1971_v44  ;;  %v1994_v40 = vmul.f32 1.442695, %v1972_v23 }
 0x580   : > { %v4302_v36 = vpop.xlane.xlu1 %1948 }
 0x581   : > { %3103 = vpow2.f32 %v1992_v14  ;;  %v1973_v58 = vsub.f32 %v4208_v34, %v4302_v36 }
 0x582   : > { %v3094_v33 = vpop.eup %3093  ;;  %3105 = vpow2.f32 %v1994_v40  ;;  %v4306_v46 = vpop.xlane.xlu0 %1950 }
 0x583   : > { %v1996_v54 = vmul.f32 1.442695, %v1973_v58  ;;  %v1974_v51 = vsub.f32 %v4217_v55, %v4306_v46  ;;  %2014 = vadd.xlane.f32.xlu0 %v3094_v33 }
 0x584   : > { %v4310_v63 = vpop.xlane.xlu1 %1952 }
 0x585   : > { %3107 = vpow2.f32 %v1996_v54  ;;  %v1998_v35 = vmul.f32 1.442695, %v1974_v51  ;;  %v1975_v2 = vsub.f32 %v4226_v29, %v4310_v63 }
 0x586   : > { %v3096_v3 = vpop.eup %3095  ;;  %v4314_v39 = vpop.xlane.xlu0 %1954 }
 0x587   : > { %v3098_v11 = vpop.eup %3097  ;;  %3109 = vpow2.f32 %v1998_v35  ;;  %v2000_v32 = vmul.f32 1.442695, %v1975_v2  ;;  %v1976_v0 = vsub.f32 %v4233_v41, %v4314_v39  ;;  %2016 = vadd.xlane.f32.xlu1 %v3096_v3 }
 0x588   : > { %2018 = vadd.xlane.f32.xlu0 %v3098_v11  ;;  %v4318_v7 = vpop.xlane.xlu1 %1956 }
 0x589   : > { %3111 = vpow2.f32 %v2000_v32  ;;  %v2002_v10 = vmul.f32 1.442695, %v1976_v0  ;;  %v1977_v20 = vsub.f32 %v4242_v26, %v4318_v7 }
 0x58a   : > { %v3100_v43 = vpop.eup %3099  ;;  %v4322_v53 = vpop.xlane.xlu0 %1958 }
 0x58b   : > { %v3102_v12 = vpop.eup %3101  ;;  %3113 = vpow2.f32 %v2002_v10  ;;  %v2004_v56 = vmul.f32 1.442695, %v1977_v20  ;;  %v1978_v15 = vsub.f32 %v4249_v42, %v4322_v53  ;;  %2020 = vadd.xlane.f32.xlu1 %v3100_v43 }
 0x58c   : > { %2022 = vadd.xlane.f32.xlu0 %v3102_v12  ;;  %v4326_v8 = vpop.xlane.xlu1 %1960 }
 0x58d   : > { %3115 = vpow2.f32 %v2004_v56  ;;  %v2006_v52 = vmul.f32 1.442695, %v1978_v15  ;;  %v1979_v19 = vsub.f32 %v4258_v59, %v4326_v8 }
 0x58e   : > { %v3104_v48 = vpop.eup %3103  ;;  %v4330_v1 = vpop.xlane.xlu0 %1962 }
 0x58f   : > { %v3106_v62 = vpop.eup %3105  ;;  %3117 = vpow2.f32 %v2006_v52  ;;  %v2008_v9 = vmul.f32 1.442695, %v1979_v19  ;;  %v1980_v45 = vsub.f32 %v4264_v5, %v4330_v1  ;;  %2024 = vadd.xlane.f32.xlu1 %v3104_v48 }
 0x590   : > { %2026 = vadd.xlane.f32.xlu0 %v3106_v62  ;;  %v4334_v13 = vpop.xlane.xlu1 %1964 }
 0x591   : > { %3119 = vpow2.f32 %v2008_v9  ;;  %v2010_v18 = vmul.f32 1.442695, %v1980_v45  ;;  %v1981_v25 = vsub.f32 %v4271_v60, %v4334_v13 }
 0x592   : > { %v3108_v50 = vpop.eup %3107 }
 0x593   : > { %3121 = vpow2.f32 %v2010_v18  ;;  %v2012_v28 = vmul.f32 1.442695, %v1981_v25  ;;  %2028 = vadd.xlane.f32.xlu1 %v3108_v50 }
 0x594   : > { %v3110_v30 = vpop.eup %3109 }
 0x595   : > { %3123 = vpow2.f32 %v2012_v28  ;;  %2030 = vadd.xlane.f32.xlu0 %v3110_v30 }
 0x596   : > { %v3112_v44 = vpop.eup %3111 }
 0x597   : > { %2032 = vadd.xlane.f32.xlu1 %v3112_v44 }
 0x598   : > { %v3114_v23 = vpop.eup %3113 }
 0x599   : > { %2034 = vadd.xlane.f32.xlu0 %v3114_v23 }
 0x59a   : > { %v3116_v14 = vpop.eup %3115 }
 0x59b   : > { %2036 = vadd.xlane.f32.xlu1 %v3116_v14 }
 0x59c   : > { %v3118_v40 = vpop.eup %3117 }
 0x59d   : > { %2038 = vadd.xlane.f32.xlu0 %v3118_v40 }
 0x59e   : > { %v3120_v58 = vpop.eup %3119 }
 0x59f   : > { %2040 = vadd.xlane.f32.xlu1 %v3120_v58 }
 0x5a0   : > { %v3122_v33 = vpop.eup %3121 }
 0x5a1   : > { %2042 = vadd.xlane.f32.xlu0 %v3122_v33 }
 0x5a2   : > { %v3124_v54 = vpop.eup %3123 }
 0x5a3   : > { %2044 = vadd.xlane.f32.xlu1 %v3124_v54 }
 0x60c   : > { %v2015_v51 = vpop.xlane.xlu0 %2014 }
 0x60d   : > { %3125 = vlog2.f32 %v2015_v51 }
 0x610   : > { %v2017_v35 = vpop.xlane.xlu1 %2016 }
 0x611   : > { %3127 = vlog2.f32 %v2017_v35  ;;  %v2019_v2 = vpop.xlane.xlu0 %2018 }
 0x612   : > { %3129 = vlog2.f32 %v2019_v2 }
 0x614   : > { %v2021_v3 = vpop.xlane.xlu1 %2020 }
 0x615   : > { %3131 = vlog2.f32 %v2021_v3  ;;  %v2023_v11 = vpop.xlane.xlu0 %2022 }
 0x616   : > { %3133 = vlog2.f32 %v2023_v11 }
 0x618   : > { %v2025_v32 = vpop.xlane.xlu1 %2024 }
 0x619   : > { %3135 = vlog2.f32 %v2025_v32  ;;  %v2027_v0 = vpop.xlane.xlu0 %2026 }
 0x61a   : > { %v3126_v10 = vpop.eup %3125  ;;  %3137 = vlog2.f32 %v2027_v0 }
 0x61b   : > { %v2047_v20 = vmul.f32 0.6931472, %v3126_v10 }
 0x61c   : > { %v2029_v43 = vpop.xlane.xlu1 %2028 }
 0x61d   : > { %v2078_v12 = vadd.f32 %v2047_v20, %v4274_v24  ;;  %3139 = vlog2.f32 %v2029_v43 }
 0x61e   : > { %v3128_v56 = vpop.eup %3127  ;;  %v2031_v15 = vpop.xlane.xlu0 %2030 }
 0x61f   : > { %v3130_v52 = vpop.eup %3129  ;;  %v2094_v19 = vsub.f32 %v4153_v37, %v2078_v12  ;;  %v2049_v48 = vmul.f32 0.6931472, %v3128_v56  ;;  %3141 = vlog2.f32 %v2031_v15 }
 0x620   : > { %v2051_v62 = vmul.f32 0.6931472, %v3130_v52  ;;  %v2033_v9 = vpop.xlane.xlu1 %2032 }
 0x621   : > { %v2110_v45 = vsel %vm1917_vm0, %v2094_v19, 0.0  ;;  %v2079_v18 = vadd.f32 %v2049_v48, %v4278_v61  ;;  %3143 = vlog2.f32 %v2033_v9 }
 0x622   : > { %v3132_v25 = vpop.eup %3131  ;;  %2126 = vst [vmem:[%s3698_s19] sm:$0xff] %v2110_v45  ;;  %v2080_v24 = vadd.f32 %v2051_v62, %v4280_v57  ;;  %v2035_v50 = vpop.xlane.xlu0 %2034 }
 0x623   : > { %v3134_v28 = vpop.eup %3133  ;;  %v2095_v37 = vsub.f32 %v4168_v38, %v2079_v18  ;;  %v2053_v30 = vmul.f32 0.6931472, %v3132_v25  ;;  %3145 = vlog2.f32 %v2035_v50 }
 0x624   : > { %v2096_v44 = vsub.f32 %v4163_v6, %v2080_v24  ;;  %v2055_v23 = vmul.f32 0.6931472, %v3134_v28  ;;  %v2037_v14 = vpop.xlane.xlu1 %2036 }
 0x625   : > { %v2111_v61 = vsel %vm1917_vm0, %v2095_v37, 0.0  ;;  %v2081_v40 = vadd.f32 %v2053_v30, %v4286_v22  ;;  %3147 = vlog2.f32 %v2037_v14 }
 0x626   : > { %v3136_v58 = vpop.eup %3135  ;;  %2127 = vst [vmem:[%s3698_s19 + $0x8] sm:$0xff] %v2111_v61  ;;  %v2112_v57 = vsel %vm1917_vm0, %v2096_v44, 0.0  ;;  %v2082_v38 = vadd.f32 %v2055_v23, %v4288_v27  ;;  %v2039_v33 = vpop.xlane.xlu0 %2038 }
 0x627   : > { %v3138_v54 = vpop.eup %3137  ;;  %2128 = vst [vmem:[%s3698_s19 + $0x10] sm:$0xff] %v2112_v57  ;;  %v2097_v6 = vsub.f32 %v4179_v21, %v2081_v40  ;;  %v2057_v51 = vmul.f32 0.6931472, %v3136_v58  ;;  %3149 = vlog2.f32 %v2039_v33 }
 0x628   : > { %v2098_v35 = vsub.f32 %v4184_v4, %v2082_v38  ;;  %v2059_v22 = vmul.f32 0.6931472, %v3138_v54  ;;  %v2041_v2 = vpop.xlane.xlu1 %2040 }
 0x629   : > { %v2113_v3 = vsel %vm1917_vm0, %v2097_v6, 0.0  ;;  %v2083_v11 = vadd.f32 %v2057_v51, %v4294_v16  ;;  %3151 = vlog2.f32 %v2041_v2 }
 0x62a   : > { %v3140_v32 = vpop.eup %3139  ;;  %2129 = vst [vmem:[%s3698_s19 + $0x18] sm:$0xff] %v2113_v3  ;;  %v2114_v27 = vsel %vm1917_vm0, %v2098_v35, 0.0  ;;  %v2084_v21 = vadd.f32 %v2059_v22, %v4296_v49  ;;  %v2043_v0 = vpop.xlane.xlu0 %2042 }
 0x62b   : > { %2130 = vst [vmem:[%s3698_s19 + $0x20] sm:$0xff] %v2114_v27  ;;  %v2099_v4 = vsub.f32 %v4195_v17, %v2083_v11  ;;  %v2061_v10 = vmul.f32 0.6931472, %v3140_v32  ;;  %3153 = vlog2.f32 %v2043_v0 }
 0x62c   : > { %v3142_v20 = vpop.eup %3141  ;;  %v2100_v43 = vsub.f32 %v4199_v31, %v2084_v21  ;;  %v2045_v16 = vpop.xlane.xlu1 %2044 }
 0x62d   : > { %v2115_v12 = vsel %vm1917_vm0, %v2099_v4, 0.0  ;;  %v2085_v56 = vadd.f32 %v2061_v10, %v4302_v36  ;;  %v2063_v15 = vmul.f32 0.6931472, %v3142_v20  ;;  %3155 = vlog2.f32 %v2045_v16 }
 0x62e   : > { %v3144_v49 = vpop.eup %3143  ;;  %2131 = vst [vmem:[%s3698_s19 + $0x28] sm:$0xff] %v2115_v12  ;;  %v2116_v52 = vsel %vm1917_vm0, %v2100_v43, 0.0 }
 0x62f   : > { %2132 = vst [vmem:[%s3698_s19 + $0x30] sm:$0xff] %v2116_v52  ;;  %v2101_v17 = vsub.f32 %v4208_v34, %v2085_v56  ;;  %v2086_v31 = vadd.f32 %v2063_v15, %v4306_v46  ;;  %v2065_v19 = vmul.f32 0.6931472, %v3144_v49 }
 0x630   : > { %v3146_v48 = vpop.eup %3145 }
 0x631   : > { %v2117_v62 = vsel %vm1917_vm0, %v2101_v17, 0.0  ;;  %v2102_v36 = vsub.f32 %v4217_v55, %v2086_v31  ;;  %v2087_v9 = vadd.f32 %v2065_v19, %v4310_v63  ;;  %v2067_v45 = vmul.f32 0.6931472, %v3146_v48 }
 0x632   : > { %v3148_v18 = vpop.eup %3147  ;;  %2133 = vst [vmem:[%s3698_s19 + $0x38] sm:$0xff] %v2117_v62 }
 0x633   : > { %v2118_v25 = vsel %vm1917_vm0, %v2102_v36, 0.0  ;;  %v2103_v34 = vsub.f32 %v4226_v29, %v2087_v9  ;;  %v2088_v46 = vadd.f32 %v2067_v45, %v4314_v39  ;;  %v2069_v24 = vmul.f32 0.6931472, %v3148_v18 }
 0x634   : > { %v3150_v50 = vpop.eup %3149  ;;  %2134 = vst [vmem:[%s3698_s19 + $0x40] sm:$0xff] %v2118_v25 }
 0x635   : > { %v2119_v55 = vsel %vm1917_vm0, %v2103_v34, 0.0  ;;  %v2104_v28 = vsub.f32 %v4233_v41, %v2088_v46  ;;  %v2089_v63 = vadd.f32 %v2069_v24, %v4318_v7  ;;  %v2071_v37 = vmul.f32 0.6931472, %v3150_v50 }
 0x636   : > { %v3152_v30 = vpop.eup %3151  ;;  %2135 = vst [vmem:[%s3698_s19 + $0x48] sm:$0xff] %v2119_v55 }
 0x637   : > { %v2120_v29 = vsel %vm1917_vm0, %v2104_v28, 0.0  ;;  %v2105_v39 = vsub.f32 %v4242_v26, %v2089_v63  ;;  %v2090_v44 = vadd.f32 %v2071_v37, %v4322_v53  ;;  %v2073_v23 = vmul.f32 0.6931472, %v3152_v30 }
 0x638   : > { %v3154_v14 = vpop.eup %3153  ;;  %2136 = vst [vmem:[%s3698_s19 + $0x50] sm:$0xff] %v2120_v29 }
 0x639   : > { %v2121_v41 = vsel %vm1917_vm0, %v2105_v39, 0.0  ;;  %v2106_v7 = vsub.f32 %v4249_v42, %v2090_v44  ;;  %v2091_v61 = vadd.f32 %v2073_v23, %v4326_v8  ;;  %v2075_v40 = vmul.f32 0.6931472, %v3154_v14 }
 0x63a   : > { %v3156_v58 = vpop.eup %3155  ;;  %2137 = vst [vmem:[%s3698_s19 + $0x58] sm:$0xff] %v2121_v41 }
 0x63b   : > { %v2122_v26 = vsel %vm1917_vm0, %v2106_v7, 0.0  ;;  %v2107_v53 = vsub.f32 %v4258_v59, %v2091_v61  ;;  %v2092_v57 = vadd.f32 %v2075_v40, %v4330_v1  ;;  %v2077_v38 = vmul.f32 0.6931472, %v3156_v58 }
 0x63c   : > { %2138 = vst [vmem:[%s3698_s19 + $0x60] sm:$0xff] %v2122_v26 }
 0x63d   : > { %v2123_v33 = vsel %vm1917_vm0, %v2107_v53, 0.0  ;;  %v2108_v42 = vsub.f32 %v4264_v5, %v2092_v57  ;;  %v2093_v8 = vadd.f32 %v2077_v38, %v4334_v13 }
 0x63e   : > { %2139 = vst [vmem:[%s3698_s19 + $0x68] sm:$0xff] %v2123_v33 }
 0x63f   : > { %v2124_v54 = vsel %vm1917_vm0, %v2108_v42, 0.0  ;;  %v2109_v6 = vsub.f32 %v4271_v60, %v2093_v8 }
 0x640   : > { %2140 = vst [vmem:[%s3698_s19 + $0x70] sm:$0xff] %v2124_v54 }
 0x641   : > { %v2125_v59 = vsel %vm1917_vm0, %v2109_v6, 0.0 }
 0x642   : > { %2141 = vst [vmem:[%s3698_s19 + $0x78] sm:$0xff] %v2125_v59 }
 0x643 PF: > { %s4565_s18 = sld [smem:[#allocation24_spill]]  ;;  %s2369_s14 = sshll.u32 %s3391_s7, 11 }
 0x644   : > { %s4566_s8 = sld [smem:[#allocation34_spill]]  ;;  %s2156_s3 = sshll.u32 %s3698_s19, 4  ;;  %s4425_s3 = int_to_ptr.vmem [resolvable:$true] %s2156_s3 }
 0x645   : > { %s4429_s6 = scalar_lea.sflag [#allocation8], %s389_s27  ;;  %s3263_s20 = scalar_lea.vmem %s4425_s3, 2048 }
 0x646   : > { %p3264_p11 = scmp.ne.s32.totalorder %s4425_s3, %s3263_s20  ;;  %s3421_s7 = smov [#allocation14]  }
 0x647   : > { %s3267_s5 = sshll.u32 %s3421_s7, 4  ;;  %s3268_s5 = int_to_ptr.vmem [resolvable:$false] %s3267_s5 }
 0x648   : > { %s3269_s10 = scalar_lea.vmem %s3268_s5, 4096  ;;  %p3270_p1 = scmp.lt.s32.totalorder %s4425_s3, %s3268_s5 }
 0x649   : > { %p4567_p0 = scmp.ne.s32.totalorder %s4565_s18, 0  ;;  %p3271_p6 = scmp.lt.s32.totalorder %s3269_s10, %s3263_s20 }
 0x64a   : > { %s4422_s26 = scalar_lea.hbm %s4566_s8, %s2369_s14 }
 0x64b   : > { %p3265_p7 = pnand %p3264_p11, %p4567_p0  ;;  %p3272_p3 = por %p3271_p6, %p3270_p1 }
 0x64d   : > { %p3266_p13 = pneg %p3265_p7 }
 0x64f   : > { %p3273_p4 = pnand %p3272_p3, %p3266_p13 }
 0x651   : > { %3276 = shalt.err (!%p3273_p4)
}
 0x652   : > { %s3277_s27 = scalar_lea.hbm %s4422_s26, 2048  ;;  %s3281_s0 = scalar_lea.hbm %s4566_s8, 4096 }
 0x653   : > { %p3278_p12 = scmp.ne.s32.totalorder %s4422_s26, %s3277_s27  ;;  %p3282_p8 = scmp.lt.s32.totalorder %s4422_s26, %s4566_s8 }
 0x654   : > { %p3283_p9 = scmp.lt.s32.totalorder %s3281_s0, %s3277_s27 }
 0x655   : > { %p3279_p10 = pnand %p3278_p12, %p4567_p0 }
 0x656   : > { %p3284_p5 = por %p3283_p9, %p3282_p8 }
 0x657   : > { %p3280_p2 = pneg %p3279_p10 }
 0x659   : > { %p3285_p11 = pnand %p3284_p5, %p3280_p2 }
 0x65b   : > { %3288 = shalt.err (!%p3285_p11)
}
 0x65c   : > { %s3422_s4 = smov 128   ;;  %s3423_s13 = smov 8  }
 0x65d   : > { %2760 = dma.vmem_to_hbm [thread:$0]  (%p4567_p0), %s4425_s3, 2048, %s4422_s26, %s4429_s6, %s3422_s4, %s3422_s4, %s3423_s13  }
 0x65e PF: > { %s4568_s24 = sld [smem:[#allocation23_spill]] }
 0x65f   : > { %s4569_s14 = sld [smem:[#allocation20_spill]] }
 0x660   : > { %s4570_s17 = sld [smem:[#allocation25_spill]] }
 0x664   : > { %p2787_p7 = scmp.ge.s32.totalorder %s4568_s24, 2 }
 0x665   : > { %s2171_s23 = sand.u32 1, %s4569_s14  }
 0x666   : > { %p4571_p13 = scmp.ne.s32.totalorder %s4570_s17, 0  ;;  %s2172_s20 = scalar_lea.sflag [#allocation8], %s2171_s23 }
 0x668   : > { %p2777_p1 = pnand %p2787_p7, %p4571_p13 }
 0x66a   : > { %p2778_p6 = pneg %p2777_p1 }
 0x66c   : > { %3358 = dma.done.wait (%p2778_p6), %s2172_s20, 2048  }
 0x66d   : > { %3360 = vsyncadd (%p2778_p6), %s2172_s20, 4294965248  ;;  %s27_s18 = sadd.s32 1, %s4568_s24   ;;  %s4573_s14 = sld [smem:[#allocation22_spill]] }
 0x66e   : > { %p4457_p3 = scmp.ge.s32.totalorder %s27_s18, 18   ;;  %s4574_s26 = sld [smem:[#allocation26_spill]] }
 0x66f   : > { %s4575_s3 = sld [smem:[#allocation27_spill]]  ;;  %s4577_s29 = smov %s3367_s30 }
 0x670   : > { %s4578_s30 = smov %s3371_s9  ;;  %s4579_s9 = smov %s3652_s25 }
 0x671   : > { %s4580_s10 = smov %s3379_s11  ;;  %s4581_s11 = smov %s3383_s12 }
 0x672   : > { %s4582_s12 = smov %s3647_s2  ;;  %s4583_s13 = smov %s3399_s15 }
 0x673   : > { %s4584_s7 = smov %s3403_s16  ;;  %s4587_s17 = smov %s4597_s21 }
 0x674   : > { %s4585_s15 = smov %s4574_s26  ;;  %26 = sbr.rel (!%p4457_p3) target bundleno = 21 (0x15), region = 125 }
 0x675   : > { %s4586_s16 = smov %s4575_s3 }
 0x679   :  { %2177 = vsyncpa [#allocation7], 1 }
 0x67a   :  { %2179 = vsyncpa [#allocation7 + $0x1], 1 }
 0x67b   :  { %2180 = vsyncpa [#allocation10], 1 }
 0x67c   :  { %2182 = vsyncpa [#allocation10 + $0x1], 1 }
 0x67d   :  { %2183 = vsyncpa [#allocation13], 1 }
 0x67e   :  { %2184 = vsyncpa [#allocation8], 1 }
 0x67f   :  { %2186 = vsyncpa [#allocation8 + $0x1], 1 }

</bundles_post_ra>
